<compile_context>
chip_gen: v5e
topology: v5e:2x2
jax: 0.10.0
libtpu: 0.0.40
codegen_flags: <defaults>
</compile_context>

<pallas_src>
import functools

import jax
import jax.numpy as jnp
from jax.experimental import pallas as pl
from jax.experimental.pallas import tpu as pltpu


def _tree_add(terms):
    """Balanced pairwise reduction (better VALU ILP than a serial chain)."""
    terms = list(terms)
    while len(terms) > 1:
        nxt = [terms[i] + terms[i + 1] for i in range(0, len(terms) - 1, 2)]
        if len(terms) % 2:
            nxt.append(terms[-1])
        terms = nxt
    return terms[0]


def _sa_kernel(x_ref, mask_ref, w1_ref, w2_ref, b1_ref, b2_ref, y_ref, *, W, C):
    # x_ref block: (Bp*C, HW)  -- Bp images' channels stacked on sublanes.
    # mask_ref:    (9, HW) f32, 1.0 where the tap's source pixel is in-bounds.
    # w1_ref: (C4, 9, Bp*C, 1) VMEM.   w2_ref: (9, Bp*C4, 1) VMEM.
    # b1_ref: (C4,) SMEM.              b2_ref: (1,) SMEM.
    x = x_ref[...]                                   # (Bp*C, HW) float32
    BC, HW = x.shape
    Bp = BC // C
    C4 = w1_ref.shape[0]

    # Hoisted loads: weights and boundary masks, read once at kernel entry.
    masks = mask_ref[...]                            # (9, HW)
    w1 = w1_ref[...]                                 # (C4, 9, Bp*C, 1)
    w2 = w2_ref[...]                                 # (9, Bp*C4, 1)

    taps = [(dy, dx) for dy in (-1, 0, 1) for dx in (-1, 0, 1)]

    def shift_tap(a, t):
        # a[:, p] <- a[:, p + dy*W + dx]; out-of-image sources forced to an
        # exact 0 (Conv2d zero padding).  Roll is XLU; the select is VPU.
        dy, dx = taps[t]
        s = dy * W + dx
        if s == 0:
            return a
        out = pltpu.roll(a, shift=(-s) % HW, axis=1)
        m = jnp.broadcast_to(masks[t:t + 1], out.shape)   # sublane broadcast
        return jnp.where(m > 0.5, out, 0.0)

    # ---- conv1 (C -> C4), 3x3, padding=1: VPU tap accumulation ------------
    x_taps = [shift_tap(x, t) for t in range(9)]     # shared by both out chans
    acc1 = [_tree_add([x_taps[t] * w1[c4, t] for t in range(9)])
            for c4 in range(C4)]                     # each (Bp*C, HW)

    h_rows = []                                      # row order: b-major, c4-minor
    for b in range(Bp):
        for c4 in range(C4):
            r = jnp.sum(acc1[c4][b * C:(b + 1) * C], axis=0, keepdims=True)
            h_rows.append(jnp.maximum(r + b1_ref[c4], 0.0))   # bias + ReLU
    h1 = jnp.concatenate(h_rows, axis=0)             # (Bp*C4, HW)

    # ---- conv2 (C4 -> 1), 3x3, padding=1 -----------------------------------
    h_taps = [shift_tap(h1, t) for t in range(9)]
    acc2 = _tree_add([h_taps[t] * w2[t] for t in range(9)])   # (Bp*C4, HW)

    # ---- y = x * sigmoid(logit), broadcast over channels; lane-dense store -
    y_rows = []
    for b in range(Bp):
        logit = jnp.sum(acc2[b * C4:(b + 1) * C4], axis=0, keepdims=True)
        att = jax.nn.sigmoid(logit + b2_ref[0])      # (1, HW), EUP sigmoid
        y_rows.append(x[b * C:(b + 1) * C] * att)
    y_ref[...] = jnp.concatenate(y_rows, axis=0).astype(y_ref.dtype)


def _tensorcores_per_chip():
    # v7x has 2 TensorCores/chip; v5e/v6e have 1 (grid split would just be a
    # serial loop there, so we fold the batch into one step instead).
    try:
        kind = jax.devices()[0].device_kind.lower()
    except Exception:
        return 1
    return 2 if ("v7" in kind or "7x" in kind) else 1


@jax.jit
def sa_forward(x_nchw, w1, b1, w2, b2):
    """x_nchw: (B, C, H, W).  w1: (C4, C, 3, 3) OIHW, b1: (C4,),
    w2: (1, C4, 3, 3) OIHW, b2: (1,).  Returns (B, C, H, W)."""
    B, C, H, W = x_nchw.shape
    C4 = w1.shape[0]
    HW = H * W

    n_tc = _tensorcores_per_chip()
    G = n_tc if (n_tc > 1 and B % n_tc == 0) else 1   # grid steps
    Bp = B // G                                       # images per step
    BC = Bp * C

    # Free reshape (contiguous): NCHW -> (B*C, HW); lanes = flattened pixels.
    x2 = x_nchw.reshape(B * C, HW).astype(jnp.float32)

    # Host-precomputed boundary masks, one per 3x3 tap (t = ky*3 + kx):
    # 1.0 where the shifted source pixel (h+dy, w+dx) lies inside the image.
    pos = jnp.arange(HW, dtype=jnp.int32)
    hh, ww = pos // W, pos % W
    rows = []
    for dy in (-1, 0, 1):
        for dx in (-1, 0, 1):
            ok = jnp.ones((HW,), dtype=bool)
            if dy == -1:
                ok &= hh >= 1
            if dy == 1:
                ok &= hh <= H - 2
            if dx == -1:
                ok &= ww >= 1
            if dx == 1:
                ok &= ww <= W - 2
            rows.append(ok)
    masks = jnp.stack(rows).astype(jnp.float32)       # (9, HW)

    # Tap-major weights (cross-correlation order, same as PyTorch), tiled
    # over the Bp images folded onto sublanes so w[*, t] is a per-row scalar.
    w1k = jnp.transpose(w1, (0, 2, 3, 1)).reshape(C4, 9, C)          # (C4,9,C)
    w1k = jnp.tile(w1k, (1, 1, Bp))[..., None].astype(jnp.float32)   # (C4,9,Bp*C,1)
    w2k = jnp.transpose(w2, (2, 3, 1, 0)).reshape(9, C4)             # (9,C4)
    w2k = jnp.tile(w2k, (1, Bp))[..., None].astype(jnp.float32)      # (9,Bp*C4,1)
    b1k = b1.astype(jnp.float32)
    b2k = b2.astype(jnp.float32)

    kernel = functools.partial(_sa_kernel, W=W, C=C)

    y2 = pl.pallas_call(
        kernel,
        out_shape=jax.ShapeDtypeStruct((B * C, HW), x_nchw.dtype),
        grid_spec=pltpu.PrefetchScalarGridSpec(
            num_scalar_prefetch=0,
            grid=(G,),
            in_specs=[
                pl.BlockSpec((BC, HW), lambda g: (g, 0)),
                pl.BlockSpec((9, HW), lambda g: (0, 0)),
                pl.BlockSpec((C4, 9, BC, 1), lambda g: (0, 0, 0, 0)),
                pl.BlockSpec((9, Bp * C4, 1), lambda g: (0, 0, 0)),
                pl.BlockSpec(memory_space=pltpu.MemorySpace.SMEM),
                pl.BlockSpec(memory_space=pltpu.MemorySpace.SMEM),
            ],
            out_specs=pl.BlockSpec((BC, HW), lambda g: (g, 0)),
        ),
        compiler_params=pltpu.CompilerParams(
            dimension_semantics=("parallel",)),
    )(x2, masks, w1k, w2k, b1k, b2k)

    return y2.reshape(B, C, H, W)


def sa_reference(x_nchw, w1, b1, w2, b2):
    """Pure-JAX reference matching PyTorch conv2d semantics (NCHW/OIHW)."""
    dn = ("NCHW", "OIHW", "NCHW")
    h = jax.lax.conv_general_dilated(x_nchw, w1, (1, 1), "SAME",
                                     dimension_numbers=dn)
    h = jnp.maximum(h + b1.reshape(1, -1, 1, 1), 0.0)
    o = jax.lax.conv_general_dilated(h, w2, (1, 1), "SAME",
                                     dimension_numbers=dn)
    att = jax.nn.sigmoid(o + b2.reshape(1, 1, 1, 1))
    return x_nchw * att


if __name__ == "__main__":
    key = jax.random.PRNGKey(0)
    B, C, H, W = 2, 8, 16, 16          # NCHW shapes implied by the module
    C4 = C // 4

    k_x, k_w1, k_b1, k_w2, k_b2 = jax.random.split(key, 5)
    x = jax.random.normal(k_x, (B, C, H, W), dtype=jnp.float32)
    # Deterministic synthetic parameters in PyTorch OIHW layout.
    w1 = 0.1 * jax.random.normal(k_w1, (C4, C, 3, 3), dtype=jnp.float32)
    b1 = 0.1 * jax.random.normal(k_b1, (C4,), dtype=jnp.float32)
    w2 = 0.1 * jax.random.normal(k_w2, (1, C4, 3, 3), dtype=jnp.float32)
    b2 = 0.1 * jax.random.normal(k_b2, (1,), dtype=jnp.float32)

    y_kernel = jax.block_until_ready(sa_forward(x, w1, b1, w2, b2))
    y_ref = jax.block_until_ready(sa_reference(x, w1, b1, w2, b2))

    assert y_kernel.shape == (B, C, H, W)
    max_err = float(jnp.max(jnp.abs(y_kernel - y_ref)))
    assert jnp.allclose(y_kernel, y_ref, atol=1e-5, rtol=1e-5), max_err

    print("KERNEL_OK")
</pallas_src>

<mosaic_0001>
module attributes {stable_mosaic.version = 11 : i64} {
  func.func @_sa_kernel(%arg0: i32, %arg1: memref<16x256xf32, #tpu.memory_space<vmem>>, %arg2: memref<9x256xf32, #tpu.memory_space<vmem>>, %arg3: memref<2x9x16x1xf32, #tpu.memory_space<vmem>>, %arg4: memref<9x4x1xf32, #tpu.memory_space<vmem>>, %arg5: memref<2xf32, #tpu.memory_space<smem>>, %arg6: memref<1xf32, #tpu.memory_space<smem>>, %arg7: memref<16x256xf32, #tpu.memory_space<vmem>>) attributes {dimension_semantics = [#tpu.dimension_semantics<parallel>], iteration_bounds = array<i64: 1>, scalar_prefetch = 0 : i64, scratch_operands = 0 : i64, tpu.core_type = #tpu.core_type<tc>, window_params = [{transform_indices = @transform_0, window_bounds = array<i64: 16, 256>}, {pipeline_mode = #tpu.pipeline_mode<synchronous>, transform_indices = @transform_1, window_bounds = array<i64: 9, 256>}, {pipeline_mode = #tpu.pipeline_mode<synchronous>, transform_indices = @transform_2, window_bounds = array<i64: 2, 9, 16, 1>}, {pipeline_mode = #tpu.pipeline_mode<synchronous>, transform_indices = @transform_3, window_bounds = array<i64: 9, 4, 1>}, {transform_indices = @transform_4, window_bounds = array<i64: 2>}, {transform_indices = @transform_5, window_bounds = array<i64: 1>}, {transform_indices = @transform_6, window_bounds = array<i64: 16, 256>}]} {
    %c0 = arith.constant 0 : index
    %c0_0 = arith.constant 0 : index
    %0 = vector.load %arg1[%c0, %c0_0] : memref<16x256xf32, #tpu.memory_space<vmem>>, vector<16x256xf32>
    %c0_1 = arith.constant 0 : index
    %c0_2 = arith.constant 0 : index
    %1 = vector.load %arg2[%c0_1, %c0_2] : memref<9x256xf32, #tpu.memory_space<vmem>>, vector<9x256xf32>
    %c0_3 = arith.constant 0 : index
    %c0_4 = arith.constant 0 : index
    %c0_5 = arith.constant 0 : index
    %c0_6 = arith.constant 0 : index
    %2 = vector.load %arg3[%c0_3, %c0_4, %c0_5, %c0_6] : memref<2x9x16x1xf32, #tpu.memory_space<vmem>>, vector<2x9x16x1xf32>
    %c0_7 = arith.constant 0 : index
    %c0_8 = arith.constant 0 : index
    %c0_9 = arith.constant 0 : index
    %3 = vector.load %arg4[%c0_7, %c0_8, %c0_9] : memref<9x4x1xf32, #tpu.memory_space<vmem>>, vector<9x4x1xf32>
    %c17_i32 = arith.constant 17 : i32
    %4 = tpu.dynamic_rotate %0 by %c17_i32 dim 1 : vector<16x256xf32>, i32 -> vector<16x256xf32>
    %5 = vector.extract_strided_slice %1 {offsets = [0, 0], sizes = [1, 256], strides = [1, 1]} : vector<9x256xf32> to vector<1x256xf32>
    %6 = vector.shape_cast %5 : vector<1x256xf32> to vector<1x256xf32>
    %7 = vector.broadcast %6 : vector<1x256xf32> to vector<16x256xf32>
    %cst = arith.constant 5.000000e-01 : f32
    %8 = vector.broadcast %cst : f32 to vector<16x256xf32>
    %9 = arith.cmpf ogt, %7, %8 : vector<16x256xf32>
    %cst_10 = arith.constant 0.000000e+00 : f32
    %10 = vector.broadcast %cst_10 : f32 to vector<16x256xf32>
    %11 = arith.select %9, %4, %10 : vector<16x256xi1>, vector<16x256xf32>
    %c16_i32 = arith.constant 16 : i32
    %12 = tpu.dynamic_rotate %0 by %c16_i32 dim 1 : vector<16x256xf32>, i32 -> vector<16x256xf32>
    %13 = vector.extract_strided_slice %1 {offsets = [1, 0], sizes = [1, 256], strides = [1, 1]} : vector<9x256xf32> to vector<1x256xf32>
    %14 = vector.shape_cast %13 : vector<1x256xf32> to vector<1x256xf32>
    %15 = vector.broadcast %14 : vector<1x256xf32> to vector<16x256xf32>
    %cst_11 = arith.constant 5.000000e-01 : f32
    %16 = vector.broadcast %cst_11 : f32 to vector<16x256xf32>
    %17 = arith.cmpf ogt, %15, %16 : vector<16x256xf32>
    %cst_12 = arith.constant 0.000000e+00 : f32
    %18 = vector.broadcast %cst_12 : f32 to vector<16x256xf32>
    %19 = arith.select %17, %12, %18 : vector<16x256xi1>, vector<16x256xf32>
    %c15_i32 = arith.constant 15 : i32
    %20 = tpu.dynamic_rotate %0 by %c15_i32 dim 1 : vector<16x256xf32>, i32 -> vector<16x256xf32>
    %21 = vector.extract_strided_slice %1 {offsets = [2, 0], sizes = [1, 256], strides = [1, 1]} : vector<9x256xf32> to vector<1x256xf32>
    %22 = vector.shape_cast %21 : vector<1x256xf32> to vector<1x256xf32>
    %23 = vector.broadcast %22 : vector<1x256xf32> to vector<16x256xf32>
    %cst_13 = arith.constant 5.000000e-01 : f32
    %24 = vector.broadcast %cst_13 : f32 to vector<16x256xf32>
    %25 = arith.cmpf ogt, %23, %24 : vector<16x256xf32>
    %cst_14 = arith.constant 0.000000e+00 : f32
    %26 = vector.broadcast %cst_14 : f32 to vector<16x256xf32>
    %27 = arith.select %25, %20, %26 : vector<16x256xi1>, vector<16x256xf32>
    %c1_i32 = arith.constant 1 : i32
    %28 = tpu.dynamic_rotate %0 by %c1_i32 dim 1 : vector<16x256xf32>, i32 -> vector<16x256xf32>
    %29 = vector.extract_strided_slice %1 {offsets = [3, 0], sizes = [1, 256], strides = [1, 1]} : vector<9x256xf32> to vector<1x256xf32>
    %30 = vector.shape_cast %29 : vector<1x256xf32> to vector<1x256xf32>
    %31 = vector.broadcast %30 : vector<1x256xf32> to vector<16x256xf32>
    %cst_15 = arith.constant 5.000000e-01 : f32
    %32 = vector.broadcast %cst_15 : f32 to vector<16x256xf32>
    %33 = arith.cmpf ogt, %31, %32 : vector<16x256xf32>
    %cst_16 = arith.constant 0.000000e+00 : f32
    %34 = vector.broadcast %cst_16 : f32 to vector<16x256xf32>
    %35 = arith.select %33, %28, %34 : vector<16x256xi1>, vector<16x256xf32>
    %c255_i32 = arith.constant 255 : i32
    %36 = tpu.dynamic_rotate %0 by %c255_i32 dim 1 : vector<16x256xf32>, i32 -> vector<16x256xf32>
    %37 = vector.extract_strided_slice %1 {offsets = [5, 0], sizes = [1, 256], strides = [1, 1]} : vector<9x256xf32> to vector<1x256xf32>
    %38 = vector.shape_cast %37 : vector<1x256xf32> to vector<1x256xf32>
    %39 = vector.broadcast %38 : vector<1x256xf32> to vector<16x256xf32>
    %cst_17 = arith.constant 5.000000e-01 : f32
    %40 = vector.broadcast %cst_17 : f32 to vector<16x256xf32>
    %41 = arith.cmpf ogt, %39, %40 : vector<16x256xf32>
    %cst_18 = arith.constant 0.000000e+00 : f32
    %42 = vector.broadcast %cst_18 : f32 to vector<16x256xf32>
    %43 = arith.select %41, %36, %42 : vector<16x256xi1>, vector<16x256xf32>
    %c241_i32 = arith.constant 241 : i32
    %44 = tpu.dynamic_rotate %0 by %c241_i32 dim 1 : vector<16x256xf32>, i32 -> vector<16x256xf32>
    %45 = vector.extract_strided_slice %1 {offsets = [6, 0], sizes = [1, 256], strides = [1, 1]} : vector<9x256xf32> to vector<1x256xf32>
    %46 = vector.shape_cast %45 : vector<1x256xf32> to vector<1x256xf32>
    %47 = vector.broadcast %46 : vector<1x256xf32> to vector<16x256xf32>
    %cst_19 = arith.constant 5.000000e-01 : f32
    %48 = vector.broadcast %cst_19 : f32 to vector<16x256xf32>
    %49 = arith.cmpf ogt, %47, %48 : vector<16x256xf32>
    %cst_20 = arith.constant 0.000000e+00 : f32
    %50 = vector.broadcast %cst_20 : f32 to vector<16x256xf32>
    %51 = arith.select %49, %44, %50 : vector<16x256xi1>, vector<16x256xf32>
    %c240_i32 = arith.constant 240 : i32
    %52 = tpu.dynamic_rotate %0 by %c240_i32 dim 1 : vector<16x256xf32>, i32 -> vector<16x256xf32>
    %53 = vector.extract_strided_slice %1 {offsets = [7, 0], sizes = [1, 256], strides = [1, 1]} : vector<9x256xf32> to vector<1x256xf32>
    %54 = vector.shape_cast %53 : vector<1x256xf32> to vector<1x256xf32>
    %55 = vector.broadcast %54 : vector<1x256xf32> to vector<16x256xf32>
    %cst_21 = arith.constant 5.000000e-01 : f32
    %56 = vector.broadcast %cst_21 : f32 to vector<16x256xf32>
    %57 = arith.cmpf ogt, %55, %56 : vector<16x256xf32>
    %cst_22 = arith.constant 0.000000e+00 : f32
    %58 = vector.broadcast %cst_22 : f32 to vector<16x256xf32>
    %59 = arith.select %57, %52, %58 : vector<16x256xi1>, vector<16x256xf32>
    %c239_i32 = arith.constant 239 : i32
    %60 = tpu.dynamic_rotate %0 by %c239_i32 dim 1 : vector<16x256xf32>, i32 -> vector<16x256xf32>
    %61 = vector.extract_strided_slice %1 {offsets = [8, 0], sizes = [1, 256], strides = [1, 1]} : vector<9x256xf32> to vector<1x256xf32>
    %62 = vector.shape_cast %61 : vector<1x256xf32> to vector<1x256xf32>
    %63 = vector.broadcast %62 : vector<1x256xf32> to vector<16x256xf32>
    %cst_23 = arith.constant 5.000000e-01 : f32
    %64 = vector.broadcast %cst_23 : f32 to vector<16x256xf32>
    %65 = arith.cmpf ogt, %63, %64 : vector<16x256xf32>
    %cst_24 = arith.constant 0.000000e+00 : f32
    %66 = vector.broadcast %cst_24 : f32 to vector<16x256xf32>
    %67 = arith.select %65, %60, %66 : vector<16x256xi1>, vector<16x256xf32>
    %68 = vector.extract_strided_slice %2 {offsets = [0, 0, 0, 0], sizes = [1, 1, 16, 1], strides = [1, 1, 1, 1]} : vector<2x9x16x1xf32> to vector<1x1x16x1xf32>
    %69 = vector.shape_cast %68 : vector<1x1x16x1xf32> to vector<16x1xf32>
    %70 = vector.broadcast %69 : vector<16x1xf32> to vector<16x256xf32>
    %71 = arith.mulf %11, %70 : vector<16x256xf32>
    %72 = vector.extract_strided_slice %2 {offsets = [0, 1, 0, 0], sizes = [1, 1, 16, 1], strides = [1, 1, 1, 1]} : vector<2x9x16x1xf32> to vector<1x1x16x1xf32>
    %73 = vector.shape_cast %72 : vector<1x1x16x1xf32> to vector<16x1xf32>
    %74 = vector.broadcast %73 : vector<16x1xf32> to vector<16x256xf32>
    %75 = arith.mulf %19, %74 : vector<16x256xf32>
    %76 = vector.extract_strided_slice %2 {offsets = [0, 2, 0, 0], sizes = [1, 1, 16, 1], strides = [1, 1, 1, 1]} : vector<2x9x16x1xf32> to vector<1x1x16x1xf32>
    %77 = vector.shape_cast %76 : vector<1x1x16x1xf32> to vector<16x1xf32>
    %78 = vector.broadcast %77 : vector<16x1xf32> to vector<16x256xf32>
    %79 = arith.mulf %27, %78 : vector<16x256xf32>
    %80 = vector.extract_strided_slice %2 {offsets = [0, 3, 0, 0], sizes = [1, 1, 16, 1], strides = [1, 1, 1, 1]} : vector<2x9x16x1xf32> to vector<1x1x16x1xf32>
    %81 = vector.shape_cast %80 : vector<1x1x16x1xf32> to vector<16x1xf32>
    %82 = vector.broadcast %81 : vector<16x1xf32> to vector<16x256xf32>
    %83 = arith.mulf %35, %82 : vector<16x256xf32>
    %84 = vector.extract_strided_slice %2 {offsets = [0, 4, 0, 0], sizes = [1, 1, 16, 1], strides = [1, 1, 1, 1]} : vector<2x9x16x1xf32> to vector<1x1x16x1xf32>
    %85 = vector.shape_cast %84 : vector<1x1x16x1xf32> to vector<16x1xf32>
    %86 = vector.broadcast %85 : vector<16x1xf32> to vector<16x256xf32>
    %87 = arith.mulf %0, %86 : vector<16x256xf32>
    %88 = vector.extract_strided_slice %2 {offsets = [0, 5, 0, 0], sizes = [1, 1, 16, 1], strides = [1, 1, 1, 1]} : vector<2x9x16x1xf32> to vector<1x1x16x1xf32>
    %89 = vector.shape_cast %88 : vector<1x1x16x1xf32> to vector<16x1xf32>
    %90 = vector.broadcast %89 : vector<16x1xf32> to vector<16x256xf32>
    %91 = arith.mulf %43, %90 : vector<16x256xf32>
    %92 = vector.extract_strided_slice %2 {offsets = [0, 6, 0, 0], sizes = [1, 1, 16, 1], strides = [1, 1, 1, 1]} : vector<2x9x16x1xf32> to vector<1x1x16x1xf32>
    %93 = vector.shape_cast %92 : vector<1x1x16x1xf32> to vector<16x1xf32>
    %94 = vector.broadcast %93 : vector<16x1xf32> to vector<16x256xf32>
    %95 = arith.mulf %51, %94 : vector<16x256xf32>
    %96 = vector.extract_strided_slice %2 {offsets = [0, 7, 0, 0], sizes = [1, 1, 16, 1], strides = [1, 1, 1, 1]} : vector<2x9x16x1xf32> to vector<1x1x16x1xf32>
    %97 = vector.shape_cast %96 : vector<1x1x16x1xf32> to vector<16x1xf32>
    %98 = vector.broadcast %97 : vector<16x1xf32> to vector<16x256xf32>
    %99 = arith.mulf %59, %98 : vector<16x256xf32>
    %100 = vector.extract_strided_slice %2 {offsets = [0, 8, 0, 0], sizes = [1, 1, 16, 1], strides = [1, 1, 1, 1]} : vector<2x9x16x1xf32> to vector<1x1x16x1xf32>
    %101 = vector.shape_cast %100 : vector<1x1x16x1xf32> to vector<16x1xf32>
    %102 = vector.broadcast %101 : vector<16x1xf32> to vector<16x256xf32>
    %103 = arith.mulf %67, %102 : vector<16x256xf32>
    %104 = arith.addf %71, %75 : vector<16x256xf32>
    %105 = arith.addf %79, %83 : vector<16x256xf32>
    %106 = arith.addf %87, %91 : vector<16x256xf32>
    %107 = arith.addf %95, %99 : vector<16x256xf32>
    %108 = arith.addf %104, %105 : vector<16x256xf32>
    %109 = arith.addf %106, %107 : vector<16x256xf32>
    %110 = arith.addf %108, %109 : vector<16x256xf32>
    %111 = arith.addf %110, %103 : vector<16x256xf32>
    %112 = vector.extract_strided_slice %2 {offsets = [1, 0, 0, 0], sizes = [1, 1, 16, 1], strides = [1, 1, 1, 1]} : vector<2x9x16x1xf32> to vector<1x1x16x1xf32>
    %113 = vector.shape_cast %112 : vector<1x1x16x1xf32> to vector<16x1xf32>
    %114 = vector.broadcast %113 : vector<16x1xf32> to vector<16x256xf32>
    %115 = arith.mulf %11, %114 : vector<16x256xf32>
    %116 = vector.extract_strided_slice %2 {offsets = [1, 1, 0, 0], sizes = [1, 1, 16, 1], strides = [1, 1, 1, 1]} : vector<2x9x16x1xf32> to vector<1x1x16x1xf32>
    %117 = vector.shape_cast %116 : vector<1x1x16x1xf32> to vector<16x1xf32>
    %118 = vector.broadcast %117 : vector<16x1xf32> to vector<16x256xf32>
    %119 = arith.mulf %19, %118 : vector<16x256xf32>
    %120 = vector.extract_strided_slice %2 {offsets = [1, 2, 0, 0], sizes = [1, 1, 16, 1], strides = [1, 1, 1, 1]} : vector<2x9x16x1xf32> to vector<1x1x16x1xf32>
    %121 = vector.shape_cast %120 : vector<1x1x16x1xf32> to vector<16x1xf32>
    %122 = vector.broadcast %121 : vector<16x1xf32> to vector<16x256xf32>
    %123 = arith.mulf %27, %122 : vector<16x256xf32>
    %124 = vector.extract_strided_slice %2 {offsets = [1, 3, 0, 0], sizes = [1, 1, 16, 1], strides = [1, 1, 1, 1]} : vector<2x9x16x1xf32> to vector<1x1x16x1xf32>
    %125 = vector.shape_cast %124 : vector<1x1x16x1xf32> to vector<16x1xf32>
    %126 = vector.broadcast %125 : vector<16x1xf32> to vector<16x256xf32>
    %127 = arith.mulf %35, %126 : vector<16x256xf32>
    %128 = vector.extract_strided_slice %2 {offsets = [1, 4, 0, 0], sizes = [1, 1, 16, 1], strides = [1, 1, 1, 1]} : vector<2x9x16x1xf32> to vector<1x1x16x1xf32>
    %129 = vector.shape_cast %128 : vector<1x1x16x1xf32> to vector<16x1xf32>
    %130 = vector.broadcast %129 : vector<16x1xf32> to vector<16x256xf32>
    %131 = arith.mulf %0, %130 : vector<16x256xf32>
    %132 = vector.extract_strided_slice %2 {offsets = [1, 5, 0, 0], sizes = [1, 1, 16, 1], strides = [1, 1, 1, 1]} : vector<2x9x16x1xf32> to vector<1x1x16x1xf32>
    %133 = vector.shape_cast %132 : vector<1x1x16x1xf32> to vector<16x1xf32>
    %134 = vector.broadcast %133 : vector<16x1xf32> to vector<16x256xf32>
    %135 = arith.mulf %43, %134 : vector<16x256xf32>
    %136 = vector.extract_strided_slice %2 {offsets = [1, 6, 0, 0], sizes = [1, 1, 16, 1], strides = [1, 1, 1, 1]} : vector<2x9x16x1xf32> to vector<1x1x16x1xf32>
    %137 = vector.shape_cast %136 : vector<1x1x16x1xf32> to vector<16x1xf32>
    %138 = vector.broadcast %137 : vector<16x1xf32> to vector<16x256xf32>
    %139 = arith.mulf %51, %138 : vector<16x256xf32>
    %140 = vector.extract_strided_slice %2 {offsets = [1, 7, 0, 0], sizes = [1, 1, 16, 1], strides = [1, 1, 1, 1]} : vector<2x9x16x1xf32> to vector<1x1x16x1xf32>
    %141 = vector.shape_cast %140 : vector<1x1x16x1xf32> to vector<16x1xf32>
    %142 = vector.broadcast %141 : vector<16x1xf32> to vector<16x256xf32>
    %143 = arith.mulf %59, %142 : vector<16x256xf32>
    %144 = vector.extract_strided_slice %2 {offsets = [1, 8, 0, 0], sizes = [1, 1, 16, 1], strides = [1, 1, 1, 1]} : vector<2x9x16x1xf32> to vector<1x1x16x1xf32>
    %145 = vector.shape_cast %144 : vector<1x1x16x1xf32> to vector<16x1xf32>
    %146 = vector.broadcast %145 : vector<16x1xf32> to vector<16x256xf32>
    %147 = arith.mulf %67, %146 : vector<16x256xf32>
    %148 = arith.addf %115, %119 : vector<16x256xf32>
    %149 = arith.addf %123, %127 : vector<16x256xf32>
    %150 = arith.addf %131, %135 : vector<16x256xf32>
    %151 = arith.addf %139, %143 : vector<16x256xf32>
    %152 = arith.addf %148, %149 : vector<16x256xf32>
    %153 = arith.addf %150, %151 : vector<16x256xf32>
    %154 = arith.addf %152, %153 : vector<16x256xf32>
    %155 = arith.addf %154, %147 : vector<16x256xf32>
    %156 = vector.extract_strided_slice %111 {offsets = [0, 0], sizes = [8, 256], strides = [1, 1]} : vector<16x256xf32> to vector<8x256xf32>
    %cst_25 = arith.constant dense<0.000000e+00> : vector<256xf32>
    %157 = vector.multi_reduction <add>, %156, %cst_25 [0] : vector<8x256xf32> to vector<256xf32>
    %158 = vector.shape_cast %157 : vector<256xf32> to vector<1x256xf32>
    %c0_26 = arith.constant 0 : index
    %159 = memref.load %arg5[%c0_26] : memref<2xf32, #tpu.memory_space<smem>>
    %160 = vector.broadcast %159 : f32 to vector<1x256xf32>
    %161 = arith.addf %158, %160 : vector<1x256xf32>
    %cst_27 = arith.constant 0.000000e+00 : f32
    %162 = vector.broadcast %cst_27 : f32 to vector<1x256xf32>
    %163 = arith.maximumf %161, %162 : vector<1x256xf32>
    %164 = vector.extract_strided_slice %155 {offsets = [0, 0], sizes = [8, 256], strides = [1, 1]} : vector<16x256xf32> to vector<8x256xf32>
    %cst_28 = arith.constant dense<0.000000e+00> : vector<256xf32>
    %165 = vector.multi_reduction <add>, %164, %cst_28 [0] : vector<8x256xf32> to vector<256xf32>
    %166 = vector.shape_cast %165 : vector<256xf32> to vector<1x256xf32>
    %c1 = arith.constant 1 : index
    %167 = memref.load %arg5[%c1] : memref<2xf32, #tpu.memory_space<smem>>
    %168 = vector.broadcast %167 : f32 to vector<1x256xf32>
    %169 = arith.addf %166, %168 : vector<1x256xf32>
    %cst_29 = arith.constant 0.000000e+00 : f32
    %170 = vector.broadcast %cst_29 : f32 to vector<1x256xf32>
    %171 = arith.maximumf %169, %170 : vector<1x256xf32>
    %172 = vector.extract_strided_slice %111 {offsets = [8, 0], sizes = [8, 256], strides = [1, 1]} : vector<16x256xf32> to vector<8x256xf32>
    %cst_30 = arith.constant dense<0.000000e+00> : vector<256xf32>
    %173 = vector.multi_reduction <add>, %172, %cst_30 [0] : vector<8x256xf32> to vector<256xf32>
    %174 = vector.shape_cast %173 : vector<256xf32> to vector<1x256xf32>
    %c0_31 = arith.constant 0 : index
    %175 = memref.load %arg5[%c0_31] : memref<2xf32, #tpu.memory_space<smem>>
    %176 = vector.broadcast %175 : f32 to vector<1x256xf32>
    %177 = arith.addf %174, %176 : vector<1x256xf32>
    %cst_32 = arith.constant 0.000000e+00 : f32
    %178 = vector.broadcast %cst_32 : f32 to vector<1x256xf32>
    %179 = arith.maximumf %177, %178 : vector<1x256xf32>
    %180 = vector.extract_strided_slice %155 {offsets = [8, 0], sizes = [8, 256], strides = [1, 1]} : vector<16x256xf32> to vector<8x256xf32>
    %cst_33 = arith.constant dense<0.000000e+00> : vector<256xf32>
    %181 = vector.multi_reduction <add>, %180, %cst_33 [0] : vector<8x256xf32> to vector<256xf32>
    %182 = vector.shape_cast %181 : vector<256xf32> to vector<1x256xf32>
    %c1_34 = arith.constant 1 : index
    %183 = memref.load %arg5[%c1_34] : memref<2xf32, #tpu.memory_space<smem>>
    %184 = vector.broadcast %183 : f32 to vector<1x256xf32>
    %185 = arith.addf %182, %184 : vector<1x256xf32>
    %cst_35 = arith.constant 0.000000e+00 : f32
    %186 = vector.broadcast %cst_35 : f32 to vector<1x256xf32>
    %187 = arith.maximumf %185, %186 : vector<1x256xf32>
    %188 = tpu.concatenate %163, %171, %179, %187 in 0 : vector<1x256xf32>, vector<1x256xf32>, vector<1x256xf32>, vector<1x256xf32> -> vector<4x256xf32>
    %c17_i32_36 = arith.constant 17 : i32
    %189 = tpu.dynamic_rotate %188 by %c17_i32_36 dim 1 : vector<4x256xf32>, i32 -> vector<4x256xf32>
    %190 = vector.extract_strided_slice %1 {offsets = [0, 0], sizes = [1, 256], strides = [1, 1]} : vector<9x256xf32> to vector<1x256xf32>
    %191 = vector.shape_cast %190 : vector<1x256xf32> to vector<1x256xf32>
    %192 = vector.broadcast %191 : vector<1x256xf32> to vector<4x256xf32>
    %cst_37 = arith.constant 5.000000e-01 : f32
    %193 = vector.broadcast %cst_37 : f32 to vector<4x256xf32>
    %194 = arith.cmpf ogt, %192, %193 : vector<4x256xf32>
    %cst_38 = arith.constant 0.000000e+00 : f32
    %195 = vector.broadcast %cst_38 : f32 to vector<4x256xf32>
    %196 = arith.select %194, %189, %195 : vector<4x256xi1>, vector<4x256xf32>
    %c16_i32_39 = arith.constant 16 : i32
    %197 = tpu.dynamic_rotate %188 by %c16_i32_39 dim 1 : vector<4x256xf32>, i32 -> vector<4x256xf32>
    %198 = vector.extract_strided_slice %1 {offsets = [1, 0], sizes = [1, 256], strides = [1, 1]} : vector<9x256xf32> to vector<1x256xf32>
    %199 = vector.shape_cast %198 : vector<1x256xf32> to vector<1x256xf32>
    %200 = vector.broadcast %199 : vector<1x256xf32> to vector<4x256xf32>
    %cst_40 = arith.constant 5.000000e-01 : f32
    %201 = vector.broadcast %cst_40 : f32 to vector<4x256xf32>
    %202 = arith.cmpf ogt, %200, %201 : vector<4x256xf32>
    %cst_41 = arith.constant 0.000000e+00 : f32
    %203 = vector.broadcast %cst_41 : f32 to vector<4x256xf32>
    %204 = arith.select %202, %197, %203 : vector<4x256xi1>, vector<4x256xf32>
    %c15_i32_42 = arith.constant 15 : i32
    %205 = tpu.dynamic_rotate %188 by %c15_i32_42 dim 1 : vector<4x256xf32>, i32 -> vector<4x256xf32>
    %206 = vector.extract_strided_slice %1 {offsets = [2, 0], sizes = [1, 256], strides = [1, 1]} : vector<9x256xf32> to vector<1x256xf32>
    %207 = vector.shape_cast %206 : vector<1x256xf32> to vector<1x256xf32>
    %208 = vector.broadcast %207 : vector<1x256xf32> to vector<4x256xf32>
    %cst_43 = arith.constant 5.000000e-01 : f32
    %209 = vector.broadcast %cst_43 : f32 to vector<4x256xf32>
    %210 = arith.cmpf ogt, %208, %209 : vector<4x256xf32>
    %cst_44 = arith.constant 0.000000e+00 : f32
    %211 = vector.broadcast %cst_44 : f32 to vector<4x256xf32>
    %212 = arith.select %210, %205, %211 : vector<4x256xi1>, vector<4x256xf32>
    %c1_i32_45 = arith.constant 1 : i32
    %213 = tpu.dynamic_rotate %188 by %c1_i32_45 dim 1 : vector<4x256xf32>, i32 -> vector<4x256xf32>
    %214 = vector.extract_strided_slice %1 {offsets = [3, 0], sizes = [1, 256], strides = [1, 1]} : vector<9x256xf32> to vector<1x256xf32>
    %215 = vector.shape_cast %214 : vector<1x256xf32> to vector<1x256xf32>
    %216 = vector.broadcast %215 : vector<1x256xf32> to vector<4x256xf32>
    %cst_46 = arith.constant 5.000000e-01 : f32
    %217 = vector.broadcast %cst_46 : f32 to vector<4x256xf32>
    %218 = arith.cmpf ogt, %216, %217 : vector<4x256xf32>
    %cst_47 = arith.constant 0.000000e+00 : f32
    %219 = vector.broadcast %cst_47 : f32 to vector<4x256xf32>
    %220 = arith.select %218, %213, %219 : vector<4x256xi1>, vector<4x256xf32>
    %c255_i32_48 = arith.constant 255 : i32
    %221 = tpu.dynamic_rotate %188 by %c255_i32_48 dim 1 : vector<4x256xf32>, i32 -> vector<4x256xf32>
    %222 = vector.extract_strided_slice %1 {offsets = [5, 0], sizes = [1, 256], strides = [1, 1]} : vector<9x256xf32> to vector<1x256xf32>
    %223 = vector.shape_cast %222 : vector<1x256xf32> to vector<1x256xf32>
    %224 = vector.broadcast %223 : vector<1x256xf32> to vector<4x256xf32>
    %cst_49 = arith.constant 5.000000e-01 : f32
    %225 = vector.broadcast %cst_49 : f32 to vector<4x256xf32>
    %226 = arith.cmpf ogt, %224, %225 : vector<4x256xf32>
    %cst_50 = arith.constant 0.000000e+00 : f32
    %227 = vector.broadcast %cst_50 : f32 to vector<4x256xf32>
    %228 = arith.select %226, %221, %227 : vector<4x256xi1>, vector<4x256xf32>
    %c241_i32_51 = arith.constant 241 : i32
    %229 = tpu.dynamic_rotate %188 by %c241_i32_51 dim 1 : vector<4x256xf32>, i32 -> vector<4x256xf32>
    %230 = vector.extract_strided_slice %1 {offsets = [6, 0], sizes = [1, 256], strides = [1, 1]} : vector<9x256xf32> to vector<1x256xf32>
    %231 = vector.shape_cast %230 : vector<1x256xf32> to vector<1x256xf32>
    %232 = vector.broadcast %231 : vector<1x256xf32> to vector<4x256xf32>
    %cst_52 = arith.constant 5.000000e-01 : f32
    %233 = vector.broadcast %cst_52 : f32 to vector<4x256xf32>
    %234 = arith.cmpf ogt, %232, %233 : vector<4x256xf32>
    %cst_53 = arith.constant 0.000000e+00 : f32
    %235 = vector.broadcast %cst_53 : f32 to vector<4x256xf32>
    %236 = arith.select %234, %229, %235 : vector<4x256xi1>, vector<4x256xf32>
    %c240_i32_54 = arith.constant 240 : i32
    %237 = tpu.dynamic_rotate %188 by %c240_i32_54 dim 1 : vector<4x256xf32>, i32 -> vector<4x256xf32>
    %238 = vector.extract_strided_slice %1 {offsets = [7, 0], sizes = [1, 256], strides = [1, 1]} : vector<9x256xf32> to vector<1x256xf32>
    %239 = vector.shape_cast %238 : vector<1x256xf32> to vector<1x256xf32>
    %240 = vector.broadcast %239 : vector<1x256xf32> to vector<4x256xf32>
    %cst_55 = arith.constant 5.000000e-01 : f32
    %241 = vector.broadcast %cst_55 : f32 to vector<4x256xf32>
    %242 = arith.cmpf ogt, %240, %241 : vector<4x256xf32>
    %cst_56 = arith.constant 0.000000e+00 : f32
    %243 = vector.broadcast %cst_56 : f32 to vector<4x256xf32>
    %244 = arith.select %242, %237, %243 : vector<4x256xi1>, vector<4x256xf32>
    %c239_i32_57 = arith.constant 239 : i32
    %245 = tpu.dynamic_rotate %188 by %c239_i32_57 dim 1 : vector<4x256xf32>, i32 -> vector<4x256xf32>
    %246 = vector.extract_strided_slice %1 {offsets = [8, 0], sizes = [1, 256], strides = [1, 1]} : vector<9x256xf32> to vector<1x256xf32>
    %247 = vector.shape_cast %246 : vector<1x256xf32> to vector<1x256xf32>
    %248 = vector.broadcast %247 : vector<1x256xf32> to vector<4x256xf32>
    %cst_58 = arith.constant 5.000000e-01 : f32
    %249 = vector.broadcast %cst_58 : f32 to vector<4x256xf32>
    %250 = arith.cmpf ogt, %248, %249 : vector<4x256xf32>
    %cst_59 = arith.constant 0.000000e+00 : f32
    %251 = vector.broadcast %cst_59 : f32 to vector<4x256xf32>
    %252 = arith.select %250, %245, %251 : vector<4x256xi1>, vector<4x256xf32>
    %253 = vector.extract_strided_slice %3 {offsets = [0, 0, 0], sizes = [1, 4, 1], strides = [1, 1, 1]} : vector<9x4x1xf32> to vector<1x4x1xf32>
    %254 = vector.shape_cast %253 : vector<1x4x1xf32> to vector<4x1xf32>
    %255 = vector.broadcast %254 : vector<4x1xf32> to vector<4x256xf32>
    %256 = arith.mulf %196, %255 : vector<4x256xf32>
    %257 = vector.extract_strided_slice %3 {offsets = [1, 0, 0], sizes = [1, 4, 1], strides = [1, 1, 1]} : vector<9x4x1xf32> to vector<1x4x1xf32>
    %258 = vector.shape_cast %257 : vector<1x4x1xf32> to vector<4x1xf32>
    %259 = vector.broadcast %258 : vector<4x1xf32> to vector<4x256xf32>
    %260 = arith.mulf %204, %259 : vector<4x256xf32>
    %261 = vector.extract_strided_slice %3 {offsets = [2, 0, 0], sizes = [1, 4, 1], strides = [1, 1, 1]} : vector<9x4x1xf32> to vector<1x4x1xf32>
    %262 = vector.shape_cast %261 : vector<1x4x1xf32> to vector<4x1xf32>
    %263 = vector.broadcast %262 : vector<4x1xf32> to vector<4x256xf32>
    %264 = arith.mulf %212, %263 : vector<4x256xf32>
    %265 = vector.extract_strided_slice %3 {offsets = [3, 0, 0], sizes = [1, 4, 1], strides = [1, 1, 1]} : vector<9x4x1xf32> to vector<1x4x1xf32>
    %266 = vector.shape_cast %265 : vector<1x4x1xf32> to vector<4x1xf32>
    %267 = vector.broadcast %266 : vector<4x1xf32> to vector<4x256xf32>
    %268 = arith.mulf %220, %267 : vector<4x256xf32>
    %269 = vector.extract_strided_slice %3 {offsets = [4, 0, 0], sizes = [1, 4, 1], strides = [1, 1, 1]} : vector<9x4x1xf32> to vector<1x4x1xf32>
    %270 = vector.shape_cast %269 : vector<1x4x1xf32> to vector<4x1xf32>
    %271 = vector.broadcast %270 : vector<4x1xf32> to vector<4x256xf32>
    %272 = arith.mulf %188, %271 : vector<4x256xf32>
    %273 = vector.extract_strided_slice %3 {offsets = [5, 0, 0], sizes = [1, 4, 1], strides = [1, 1, 1]} : vector<9x4x1xf32> to vector<1x4x1xf32>
    %274 = vector.shape_cast %273 : vector<1x4x1xf32> to vector<4x1xf32>
    %275 = vector.broadcast %274 : vector<4x1xf32> to vector<4x256xf32>
    %276 = arith.mulf %228, %275 : vector<4x256xf32>
    %277 = vector.extract_strided_slice %3 {offsets = [6, 0, 0], sizes = [1, 4, 1], strides = [1, 1, 1]} : vector<9x4x1xf32> to vector<1x4x1xf32>
    %278 = vector.shape_cast %277 : vector<1x4x1xf32> to vector<4x1xf32>
    %279 = vector.broadcast %278 : vector<4x1xf32> to vector<4x256xf32>
    %280 = arith.mulf %236, %279 : vector<4x256xf32>
    %281 = vector.extract_strided_slice %3 {offsets = [7, 0, 0], sizes = [1, 4, 1], strides = [1, 1, 1]} : vector<9x4x1xf32> to vector<1x4x1xf32>
    %282 = vector.shape_cast %281 : vector<1x4x1xf32> to vector<4x1xf32>
    %283 = vector.broadcast %282 : vector<4x1xf32> to vector<4x256xf32>
    %284 = arith.mulf %244, %283 : vector<4x256xf32>
    %285 = vector.extract_strided_slice %3 {offsets = [8, 0, 0], sizes = [1, 4, 1], strides = [1, 1, 1]} : vector<9x4x1xf32> to vector<1x4x1xf32>
    %286 = vector.shape_cast %285 : vector<1x4x1xf32> to vector<4x1xf32>
    %287 = vector.broadcast %286 : vector<4x1xf32> to vector<4x256xf32>
    %288 = arith.mulf %252, %287 : vector<4x256xf32>
    %289 = arith.addf %256, %260 : vector<4x256xf32>
    %290 = arith.addf %264, %268 : vector<4x256xf32>
    %291 = arith.addf %272, %276 : vector<4x256xf32>
    %292 = arith.addf %280, %284 : vector<4x256xf32>
    %293 = arith.addf %289, %290 : vector<4x256xf32>
    %294 = arith.addf %291, %292 : vector<4x256xf32>
    %295 = arith.addf %293, %294 : vector<4x256xf32>
    %296 = arith.addf %295, %288 : vector<4x256xf32>
    %297 = vector.extract_strided_slice %296 {offsets = [0, 0], sizes = [2, 256], strides = [1, 1]} : vector<4x256xf32> to vector<2x256xf32>
    %cst_60 = arith.constant dense<0.000000e+00> : vector<256xf32>
    %298 = vector.multi_reduction <add>, %297, %cst_60 [0] : vector<2x256xf32> to vector<256xf32>
    %299 = vector.shape_cast %298 : vector<256xf32> to vector<1x256xf32>
    %c0_61 = arith.constant 0 : index
    %300 = memref.load %arg6[%c0_61] : memref<1xf32, #tpu.memory_space<smem>>
    %301 = vector.broadcast %300 : f32 to vector<1x256xf32>
    %302 = arith.addf %299, %301 : vector<1x256xf32>
    %303 = arith.negf %302 : vector<1x256xf32>
    %304 = math.exp %303 : vector<1x256xf32>
    %cst_62 = arith.constant 1.000000e+00 : f32
    %305 = vector.broadcast %cst_62 : f32 to vector<1x256xf32>
    %306 = arith.addf %305, %304 : vector<1x256xf32>
    %307 = arith.divf %305, %306 : vector<1x256xf32>
    %308 = vector.extract_strided_slice %0 {offsets = [0, 0], sizes = [8, 256], strides = [1, 1]} : vector<16x256xf32> to vector<8x256xf32>
    %309 = vector.broadcast %307 : vector<1x256xf32> to vector<8x256xf32>
    %310 = arith.mulf %308, %309 : vector<8x256xf32>
    %311 = vector.extract_strided_slice %296 {offsets = [2, 0], sizes = [2, 256], strides = [1, 1]} : vector<4x256xf32> to vector<2x256xf32>
    %cst_63 = arith.constant dense<0.000000e+00> : vector<256xf32>
    %312 = vector.multi_reduction <add>, %311, %cst_63 [0] : vector<2x256xf32> to vector<256xf32>
    %313 = vector.shape_cast %312 : vector<256xf32> to vector<1x256xf32>
    %c0_64 = arith.constant 0 : index
    %314 = memref.load %arg6[%c0_64] : memref<1xf32, #tpu.memory_space<smem>>
    %315 = vector.broadcast %314 : f32 to vector<1x256xf32>
    %316 = arith.addf %313, %315 : vector<1x256xf32>
    %317 = arith.negf %316 : vector<1x256xf32>
    %318 = math.exp %317 : vector<1x256xf32>
    %cst_65 = arith.constant 1.000000e+00 : f32
    %319 = vector.broadcast %cst_65 : f32 to vector<1x256xf32>
    %320 = arith.addf %319, %318 : vector<1x256xf32>
    %321 = arith.divf %319, %320 : vector<1x256xf32>
    %322 = vector.extract_strided_slice %0 {offsets = [8, 0], sizes = [8, 256], strides = [1, 1]} : vector<16x256xf32> to vector<8x256xf32>
    %323 = vector.broadcast %321 : vector<1x256xf32> to vector<8x256xf32>
    %324 = arith.mulf %322, %323 : vector<8x256xf32>
    %325 = tpu.concatenate %310, %324 in 0 : vector<8x256xf32>, vector<8x256xf32> -> vector<16x256xf32>
    %c0_66 = arith.constant 0 : index
    %c0_67 = arith.constant 0 : index
    %326 = vector.load %arg7[%c0_66, %c0_67] : memref<16x256xf32, #tpu.memory_space<vmem>>, vector<16x256xf32>
    tpu.vector_store %arg7[%c0_66, %c0_67], %325 {strides = array<i32>} : memref<16x256xf32, #tpu.memory_space<vmem>>, vector<16x256xf32>,
    return
  }
  func.func @transform_0(%arg0: i32) -> (i32, i32) {
    %c0_i32 = arith.constant 0 : i32
    %c0_i32_0 = arith.constant 0 : i32
    return %arg0, %c0_i32 : i32, i32
  }
  func.func @transform_1(%arg0: i32) -> (i32, i32) {
    %c0_i32 = arith.constant 0 : i32
    %c0_i32_0 = arith.constant 0 : i32
    %c0_i32_1 = arith.constant 0 : i32
    return %c0_i32, %c0_i32_0 : i32, i32
  }
  func.func @transform_2(%arg0: i32) -> (i32, i32, i32, i32) {
    %c0_i32 = arith.constant 0 : i32
    %c0_i32_0 = arith.constant 0 : i32
    %c0_i32_1 = arith.constant 0 : i32
    %c0_i32_2 = arith.constant 0 : i32
    %c0_i32_3 = arith.constant 0 : i32
    return %c0_i32, %c0_i32_0, %c0_i32_1, %c0_i32_2 : i32, i32, i32, i32
  }
  func.func @transform_3(%arg0: i32) -> (i32, i32, i32) {
    %c0_i32 = arith.constant 0 : i32
    %c0_i32_0 = arith.constant 0 : i32
    %c0_i32_1 = arith.constant 0 : i32
    %c0_i32_2 = arith.constant 0 : i32
    return %c0_i32, %c0_i32_0, %c0_i32_1 : i32, i32, i32
  }
  func.func @transform_4(%arg0: i32) -> i32 {
    %c0_i32 = arith.constant 0 : i32
    %c0_i32_0 = arith.constant 0 : i32
    return %c0_i32 : i32
  }
  func.func @transform_5(%arg0: i32) -> i32 {
    %c0_i32 = arith.constant 0 : i32
    %c0_i32_0 = arith.constant 0 : i32
    return %c0_i32 : i32
  }
  func.func @transform_6(%arg0: i32) -> (i32, i32) {
    %c0_i32 = arith.constant 0 : i32
    %c0_i32_0 = arith.constant 0 : i32
    return %arg0, %c0_i32 : i32, i32
  }
}

</mosaic_0001>

<bundles_post_ra>
// kernel: sa_forward.1
= control target key start
LH: loop header
LB: loop body
LE: loop exit
PB: predicated region body
PF: predicated region fallthrough
CT: control target
= control target key end

     0   :  { %12 = vsyncpa [#allocation4], 0  ;;  %s979_s24 = smov [#allocation3]   ;;  %s1888_s0 = inlined_call_operand.vmem [shape: f32[16,256], index: 0, kind: input, shape index: {}]   ;;  %s1889_s1 = inlined_call_operand.vmem [shape: f32[9,256], index: 1, kind: input, shape index: {}]   ;;  %s1890_s2 = inlined_call_operand.vmem [shape: f32[2,9,16,1], index: 2, kind: input, shape index: {}]   ;;  %s1891_s3 = inlined_call_operand.vmem [shape: f32[9,4,1], index: 3, kind: input, shape index: {}]   ;;  %s1892_s4 = inlined_call_operand.vmem [shape: f32[2], index: 4, kind: input, shape index: {}]   ;;  %s1893_s5 = inlined_call_operand.<no memory space> [shape: f32[1], index: 5, kind: input, shape index: {}]   ;;  %s1894_s6 = inlined_call_operand.vmem [shape: f32[16,256], index: 6, kind: output, shape index: {}]  }
   0x1   :  { %s26_s23 = sshll.u32 %s1892_s4, 4  ;;  %s27_s23 = int_to_ptr.vmem [resolvable:$true] %s26_s23 }
   0x2   :  { %29 = dma.vmem_to_smem %s27_s23, 16, %s979_s24, [#allocation4]  }
   0x3   :  { %977 = dma.done.wait [#allocation4], 16  }
   0x4   :  { %978 = vsyncadd [#allocation4], 4294967280 }
   0x5   :  { %36 = sfence }
   0x6   :  { %v1030_v0 = vld [vmem:[%s1888_s0 + $0x8] sm:$0xff]  ;;  %v1035_v1 = vld [vmem:[%s1888_s0] sm:$0xff]  ;;  %s980_s29 = smov 17   ;;  %s981_s4 = smov 16   ;;  %v1046_v2 = vld [vmem:[%s1888_s0 + $0x18] sm:$0xff]  ;;  %v985_v4 = vmov 0   ;;  %v98_v17 = vlaneseq }
   0x7   :  { %1922 = vst [vmem:[#allocation6_spill] sm:$0xff] %v1030_v0  ;;  %94 = vrot.lane.b32.xlu1 %v1030_v0, %s980_s29  ;;  %113 = vrot.lane.b32.xlu2 %v1035_v1, %s981_s4  ;;  %v1051_v3 = vld [vmem:[%s1888_s0 + $0x10] sm:$0xff]  ;;  %s982_s10 = smov 15   ;;  %s983_s11 = smov 1   ;;  %v45_v5 = vld [vmem:[%s1890_s2] sm:$0xff] }
   0x8   :  { %1923 = vst [vmem:[#allocation7_spill] sm:$0xff] %v1035_v1  ;;  %90 = vrot.lane.b32.xlu0 %v1035_v1, %s980_s29  ;;  %s984_s12 = smov 127   ;;  %940 = vset.pattern.permute.xlu2 %v985_v4  ;;  %s986_s13 = smov 113   ;;  %v47_v6 = vld [vmem:[%s1890_s2 + $0x10] sm:$0xff]  ;;  %v48_v7 = vld [vmem:[%s1890_s2 + $0x18] sm:$0xff]  ;;  %v46_v8 = vld [vmem:[%s1890_s2 + $0x8] sm:$0xff] }
   0x9   :  { %942 = vset.pattern.permute.xlu1 %v985_v4  ;;  %941 = vset.pattern.permute.xlu0 %v985_v4  ;;  %s987_s14 = smov 112   ;;  %s988_s15 = smov 111   ;;  %v49_v10 = vld [vmem:[%s1890_s2 + $0x20] sm:$0xff]  ;;  %v50_v11 = vld [vmem:[%s1890_s2 + $0x28] sm:$0xff]  ;;  %v51_v12 = vld [vmem:[%s1890_s2 + $0x30] sm:$0xff]  ;;  %v1147_v21 = vand.u32 127, %v98_v17 }
   0xa   :  { %v52_v14 = vld [vmem:[%s1890_s2 + $0x38] sm:$0xff]  ;;  %v53_v15 = vld [vmem:[%s1890_s2 + $0x40] sm:$0xff]  ;;  %v54_v16 = vld [vmem:[%s1890_s2 + $0x48] sm:$0xff]  ;;  %s925_s27 = sld [smem:[#allocation3 + $0x1]] }
   0xb   :  { %v55_v19 = vld [vmem:[%s1890_s2 + $0x50] sm:$0xff]  ;;  %v56_v20 = vld [vmem:[%s1890_s2 + $0x58] sm:$0xff]  ;;  %1924 = vst [vmem:[#allocation8_spill] sm:$0xff] %v1147_v21  ;;  %v57_v22 = vld [vmem:[%s1890_s2 + $0x60] sm:$0xff]  ;;  %vm1915_vm0 = vcmp.lt.s32.totalorder %v1147_v21, 17  ;;  %vm1907_vm1 = vcmp.lt.s32.totalorder %v1147_v21, 16 }
   0xc   :  { %v58_v28 = vld [vmem:[%s1890_s2 + $0x68] sm:$0xff]  ;;  %v59_v29 = vld [vmem:[%s1890_s2 + $0x70] sm:$0xff]  ;;  %v60_v30 = vld [vmem:[%s1890_s2 + $0x78] sm:$0xff]  ;;  %vm1914_vm2 = vcmp.lt.s32.totalorder %v1147_v21, 15  ;;  %vm1906_vm3 = vcmp.lt.s32.totalorder %v1147_v21, 1  ;;  %vm1903_vm4 = vcmp.lt.s32.totalorder %v1147_v21, 127 }
   0xd   :  { %v61_v36 = vld [vmem:[%s1890_s2 + $0x80] sm:$0xff]  ;;  %v62_v37 = vld [vmem:[%s1890_s2 + $0x88] sm:$0xff]  ;;  %v63_v38 = vld [vmem:[%s1890_s2 + $0x90] sm:$0xff]  ;;  %vm1905_vm7 = vcmp.lt.s32.totalorder %v1147_v21, 113  ;;  %vm1902_vm10 = vcmp.lt.s32.totalorder %v1147_v21, 112  ;;  %vm1901_vm13 = vcmp.lt.s32.totalorder %v1147_v21, 111 }
   0xe   :  { %v64_v46 = vld [vmem:[%s1890_s2 + $0x98] sm:$0xff]  ;;  %v65_v47 = vld [vmem:[%s1890_s2 + $0xa0] sm:$0xff]  ;;  %v66_v48 = vld [vmem:[%s1890_s2 + $0xa8] sm:$0xff] }
   0xf   :  { %96 = vrot.lane.b32.xlu1 %v1046_v2, %s980_s29  ;;  %115 = vrot.lane.b32.xlu2 %v1051_v3, %s981_s4  ;;  %v67_v56 = vld [vmem:[%s1890_s2 + $0xb0] sm:$0xff]  ;;  %v68_v57 = vld [vmem:[%s1890_s2 + $0xb8] sm:$0xff] }
  0x10   :  { %92 = vrot.lane.b32.xlu0 %v1051_v3, %s980_s29  ;;  %v69_v58 = vld [vmem:[%s1890_s2 + $0xc0] sm:$0xff]  ;;  %v70_v4 = vld [vmem:[%s1890_s2 + $0xc8] sm:$0xff] }
  0x17   :  { %119 = vrot.lane.b32.xlu1 %v1046_v2, %s981_s4  ;;  %134 = vrot.lane.b32.xlu2 %v1035_v1, %s982_s10 }
  0x18   :  { %117 = vrot.lane.b32.xlu0 %v1030_v0, %s981_s4 }
  0x1f   :  { %138 = vrot.lane.b32.xlu1 %v1030_v0, %s982_s10  ;;  %140 = vrot.lane.b32.xlu2 %v1046_v2, %s982_s10 }
  0x20   :  { %136 = vrot.lane.b32.xlu0 %v1051_v3, %s982_s10 }
  0x27   :  { %157 = vrot.lane.b32.xlu1 %v1051_v3, %s983_s11  ;;  %159 = vrot.lane.b32.xlu2 %v1030_v0, %s983_s11 }
  0x28   :  { %155 = vrot.lane.b32.xlu0 %v1035_v1, %s983_s11 }
  0x2f   :  { %176 = vrot.lane.b32.xlu1 %v1035_v1, %s984_s12  ;;  %178 = vrot.lane.b32.xlu2 %v1051_v3, %s984_s12 }
  0x30   :  { %161 = vrot.lane.b32.xlu0 %v1046_v2, %s983_s11 }
  0x37   :  { %182 = vrot.lane.b32.xlu1 %v1046_v2, %s984_s12  ;;  %197 = vrot.lane.b32.xlu2 %v1035_v1, %s986_s13 }
  0x38   :  { %180 = vrot.lane.b32.xlu0 %v1030_v0, %s984_s12 }
  0x3f   :  { %201 = vrot.lane.b32.xlu1 %v1030_v0, %s986_s13  ;;  %203 = vrot.lane.b32.xlu2 %v1046_v2, %s986_s13 }
  0x40   :  { %199 = vrot.lane.b32.xlu0 %v1051_v3, %s986_s13 }
  0x47   :  { %220 = vrot.lane.b32.xlu1 %v1051_v3, %s987_s14  ;;  %222 = vrot.lane.b32.xlu2 %v1030_v0, %s987_s14 }
  0x48   :  { %218 = vrot.lane.b32.xlu0 %v1035_v1, %s987_s14 }
  0x4f   :  { %239 = vrot.lane.b32.xlu1 %v1035_v1, %s988_s15  ;;  %241 = vrot.lane.b32.xlu2 %v1051_v3, %s988_s15 }
  0x50   :  { %224 = vrot.lane.b32.xlu0 %v1046_v2, %s987_s14 }
  0x57   :  { %245 = vrot.lane.b32.xlu1 %v1046_v2, %s988_s15  ;;  %262 = vperm.xlu2 %940, %v45_v5   ;;  %v71_v5 = vld [vmem:[%s1890_s2 + $0xd0] sm:$0xff] }
  0x58   :  { %243 = vrot.lane.b32.xlu0 %v1030_v0, %s988_s15 }
  0x5f   :  { %276 = vperm.xlu1 %942, %v47_v6   ;;  %281 = vperm.xlu2 %940, %v48_v7   ;;  %v73_v6 = vld [vmem:[%s1890_s2 + $0xe0] sm:$0xff] }
  0x60   :  { %267 = vperm.xlu0 %941, %v46_v8  }
  0x61   :  { %v114_v9 = vpop.permute.xlu2 %113 }
  0x67   :  { %290 = vperm.xlu1 %942, %v49_v10   ;;  %295 = vperm.xlu2 %940, %v50_v11  }
  0x68   :  { %304 = vperm.xlu0 %941, %v51_v12   ;;  %v75_v12 = vld [vmem:[%s1890_s2 + $0xf0] sm:$0xff] }
  0x69   :  { %v116_v13 = vpop.permute.xlu2 %115 }
  0x6f   :  { %309 = vperm.xlu1 %942, %v52_v14   ;;  %318 = vperm.xlu2 %940, %v53_v15   ;;  %v72_v14 = vld [vmem:[%s1890_s2 + $0xd8] sm:$0xff]  ;;  %v1280_v15 = vld [vmem:[%s1889_s1] sm:$0xff] }
  0x70   :  { %323 = vperm.xlu0 %941, %v54_v16   ;;  %v1285_v16 = vld [vmem:[%s1889_s1 + $0x8] sm:$0xff] }
  0x71   :  { %v135_v18 = vpop.permute.xlu2 %134 }
  0x77   :  { %332 = vperm.xlu1 %942, %v55_v19   ;;  %337 = vperm.xlu2 %940, %v56_v20  }
  0x78   :  { %346 = vperm.xlu0 %941, %v57_v22  }
  0x79   :  { %v95_v23 = vpop.permute.xlu1 %94  ;;  %v141_v24 = vpop.permute.xlu2 %140 }
  0x7a   :  { %v91_v25 = vpop.permute.xlu0 %90 }
  0x7b   :  { %v1155_v26 = vsel %vm1915_vm0, %v91_v25, %v95_v23  ;;  %v1159_v27 = vsel %vm1915_vm0, %v95_v23, %v91_v25  ;;  %v105_v23 = vperm.slane %v1280_v15, 0 }
  0x7d   :  { %vm1316_vm5 = vcmp.gt.f32.partialorder %v105_v23, 0.5 }
  0x7f   :  { %351 = vperm.xlu1 %942, %v58_v28   ;;  %360 = vperm.xlu2 %940, %v59_v29   ;;  %v74_v29 = vld [vmem:[%s1890_s2 + $0xe8] sm:$0xff] }
  0x80   :  { %365 = vperm.xlu0 %941, %v60_v30   ;;  %v76_v30 = vld [vmem:[%s1890_s2 + $0xf8] sm:$0xff] }
  0x81   :  { %v97_v31 = vpop.permute.xlu1 %96  ;;  %v160_v32 = vpop.permute.xlu2 %159 }
  0x82   :  { %v93_v33 = vpop.permute.xlu0 %92 }
  0x83   :  { %v1172_v34 = vsel %vm1915_vm0, %v93_v33, %v97_v31  ;;  %v1176_v35 = vsel %vm1915_vm0, %v97_v31, %v93_v33  ;;  %v78_v31 = vld [vmem:[%s1890_s2 + $0x108] sm:$0xff]  ;;  %v1928_v33 = vmov 0 }
  0x87   :  { %374 = vperm.xlu1 %942, %v61_v36   ;;  %379 = vperm.xlu2 %940, %v62_v37  }
  0x88   :  { %420 = vperm.xlu0 %941, %v63_v38   ;;  %v1328_v38 = vsel %vm1316_vm5, %v1159_v27, 0.0 }
  0x89   :  { %v120_v39 = vpop.permute.xlu1 %119  ;;  %v179_v40 = vpop.permute.xlu2 %178 }
  0x8a   :  { %v1190_v41 = vsel %vm1907_vm1, %v116_v13, %v120_v39  ;;  %v1194_v42 = vsel %vm1907_vm1, %v120_v39, %v116_v13  ;;  %v118_v43 = vpop.permute.xlu0 %117  ;;  %v77_v13 = vld [vmem:[%s1890_s2 + $0x100] sm:$0xff] }
  0x8b   :  { %v1198_v44 = vsel %vm1907_vm1, %v114_v9, %v118_v43  ;;  %v1202_v45 = vsel %vm1907_vm1, %v118_v43, %v114_v9  ;;  %v127_v43 = vperm.slane %v1285_v16, 1 }
  0x8d   :  { %vm1367_vm9 = vcmp.gt.f32.partialorder %v127_v43, 0.5 }
  0x8f   :  { %425 = vperm.xlu1 %942, %v64_v46   ;;  %434 = vperm.xlu2 %940, %v65_v47  }
  0x90   :  { %439 = vperm.xlu0 %941, %v66_v48  }
  0x91   :  { %v139_v49 = vpop.permute.xlu1 %138  ;;  %v1214_v50 = vpop.permute.xlu2 %197 }
  0x92   :  { %v1218_v51 = vsel %vm1914_vm2, %v135_v18, %v139_v49  ;;  %v1222_v52 = vsel %vm1914_vm2, %v139_v49, %v135_v18  ;;  %v137_v53 = vpop.permute.xlu0 %136 }
  0x93   :  { %v1226_v54 = vsel %vm1914_vm2, %v137_v53, %v141_v24  ;;  %v1230_v55 = vsel %vm1914_vm2, %v141_v24, %v137_v53  ;;  %v106_v24 = vperm.slane %v1285_v16, 0 }
  0x95   :  { %vm1320_vm6 = vcmp.gt.f32.partialorder %v106_v24, 0.5 }
  0x96   :  { %v1929_v33 = vsel %vm1320_vm6, 4294967295, %v1928_v33  ;;  %v1333_v39 = vsel %vm1320_vm6, %v1155_v26, 0.0 }
  0x97   :  { %448 = vperm.xlu1 %942, %v67_v56   ;;  %453 = vperm.xlu2 %940, %v68_v57   ;;  %1930 = vst [vmem:[#allocation10_spill] sm:$0xff] %v1929_v33  ;;  %v79_v56 = vld [vmem:[%s1890_s2 + $0x110] sm:$0xff]  ;;  %v1931_v57 = vmov 0 }
  0x98   :  { %462 = vperm.xlu0 %941, %v69_v58   ;;  %v1934_v58 = vmov 0 }
  0x99   :  { %v158_v59 = vpop.permute.xlu1 %157  ;;  %v204_v60 = vpop.permute.xlu2 %203  ;;  %v1935_v58 = vsel %vm1367_vm9, 4294967295, %v1934_v58 }
  0x9a   :  { %v156_v61 = vpop.permute.xlu0 %155  ;;  %1936 = vst [vmem:[#allocation12_spill] sm:$0xff] %v1935_v58 }
  0x9b   :  { %v1244_v62 = vsel %vm1906_vm3, %v156_v61, %v160_v32  ;;  %v1248_v63 = vsel %vm1906_vm3, %v160_v32, %v156_v61  ;;  %v1925_v32 = vmov 0  ;;  %v1380_v61 = vsel %vm1367_vm9, %v1190_v41, 0.0 }
  0x9c   :  { %v1926_v32 = vsel %vm1316_vm5, 4294967295, %v1925_v32  ;;  %v1937_v41 = vmov 0 }
  0x9d   :  { %1927 = vst [vmem:[#allocation9_spill] sm:$0xff] %v1926_v32 }
  0x9f   :  { %467 = vperm.xlu1 %942, %v70_v4   ;;  %476 = vperm.xlu2 %940, %v71_v5  }
  0xa0   :  { %490 = vperm.xlu0 %941, %v73_v6  }
  0xa1   :  { %v177_v7 = vpop.permute.xlu1 %176  ;;  %v223_v8 = vpop.permute.xlu2 %222 }
  0xa2   :  { %v162_v9 = vpop.permute.xlu0 %161 }
  0xa3   :  { %v1261_v10 = vsel %vm1906_vm3, %v158_v59, %v162_v9  ;;  %v1265_v11 = vsel %vm1906_vm3, %v162_v9, %v158_v59 }
  0xa7   :  { %504 = vperm.xlu1 %942, %v75_v12   ;;  %518 = vperm.xlu2 %940, %v77_v13   ;;  %v148_v13 = vperm.slane %v1285_v16, 2 }
  0xa8   :  { %481 = vperm.xlu0 %941, %v72_v14   ;;  %v1940_v14 = vmov 0 }
  0xa9   :  { %v183_v17 = vpop.permute.xlu1 %182  ;;  %v1287_v18 = vpop.permute.xlu2 %241  ;;  %vm1398_vm12 = vcmp.gt.f32.partialorder %v148_v13, 0.5  ;;  %v1463_v13 = vsel %vm1320_vm6, %v1172_v34, 0.0  ;;  %v1946_v34 = vmov 0 }
  0xaa   :  { %v1291_v19 = vsel %vm1903_vm4, %v179_v40, %v183_v17  ;;  %v1295_v20 = vsel %vm1903_vm4, %v183_v17, %v179_v40  ;;  %v181_v22 = vpop.permute.xlu0 %180  ;;  %v126_v40 = vperm.slane %v1280_v15, 1  ;;  %v1941_v14 = vsel %vm1398_vm12, 4294967295, %v1940_v14 }
  0xab   :  { %v1301_v25 = vsel %vm1903_vm4, %v177_v7, %v181_v22  ;;  %v1305_v28 = vsel %vm1903_vm4, %v181_v22, %v177_v7  ;;  %1942 = vst [vmem:[#allocation14_spill] sm:$0xff] %v1941_v14  ;;  %v190_v14 = vperm.slane %v1285_v16, 5 }
  0xac   :  { %vm1363_vm8 = vcmp.gt.f32.partialorder %v126_v40, 0.5 }
  0xad   :  { %v1932_v57 = vsel %vm1363_vm8, 4294967295, %v1931_v57 }
  0xae   :  { %1933 = vst [vmem:[#allocation11_spill] sm:$0xff] %v1932_v57  ;;  %v1943_v57 = vmov 0 }
  0xaf   :  { %495 = vperm.xlu1 %942, %v74_v29   ;;  %509 = vperm.xlu2 %940, %v76_v30  }
  0xb0   :  { %523 = vperm.xlu0 %941, %v78_v31  }
  0xb1   :  { %v202_v36 = vpop.permute.xlu1 %201  ;;  %v263_v37 = vpop.permute.xlu2 %262 }
  0xb2   :  { %v1340_v46 = vsel %vm1905_vm7, %v1214_v50, %v202_v36  ;;  %v1345_v47 = vsel %vm1905_vm7, %v202_v36, %v1214_v50  ;;  %v270_v27 = vmul.f32 %v263_v37, %v1328_v38  ;;  %v271_v48 = vmul.f32 %v263_v37, %v1333_v39  ;;  %v200_v26 = vpop.permute.xlu0 %199  ;;  %v80_v50 = vld [vmem:[%s1890_s2 + $0x118] sm:$0xff] }
  0xb3   :  { %v1351_v49 = vsel %vm1905_vm7, %v200_v26, %v204_v60  ;;  %v1355_v53 = vsel %vm1905_vm7, %v204_v60, %v200_v26  ;;  %v1375_v60 = vsel %vm1363_vm8, %v1194_v42, 0.0  ;;  %v147_v42 = vperm.slane %v1280_v15, 2 }
  0xb5   :  { %vm1394_vm11 = vcmp.gt.f32.partialorder %v147_v42, 0.5  ;;  %v1458_v42 = vsel %vm1316_vm5, %v1176_v35, 0.0 }
  0xb6   :  { %v1938_v41 = vsel %vm1394_vm11, 4294967295, %v1937_v41  ;;  %v1405_v23 = vsel %vm1394_vm11, %v1230_v55, 0.0 }
  0xb7   :  { %532 = vperm.xlu1 %942, %v79_v56   ;;  %537 = vperm.xlu2 %940, %v80_v50   ;;  %1939 = vst [vmem:[#allocation13_spill] sm:$0xff] %v1938_v41 }
  0xb9   :  { %v221_v59 = vpop.permute.xlu1 %220  ;;  %v282_v4 = vpop.permute.xlu2 %281 }
  0xba   :  { %v286_v5 = vmul.f32 %v282_v4, %v1375_v60  ;;  %v287_v6 = vmul.f32 %v282_v4, %v1380_v61  ;;  %v219_v7 = vpop.permute.xlu0 %218 }
  0xbb   :  { %v1386_v9 = vsel %vm1902_vm10, %v219_v7, %v223_v8  ;;  %v1390_v12 = vsel %vm1902_vm10, %v223_v8, %v219_v7  ;;  %v1410_v8 = vsel %vm1398_vm12, %v1226_v54, 0.0 }
  0xc1   :  { %v240_v17 = vpop.permute.xlu1 %239  ;;  %v296_v22 = vpop.permute.xlu2 %295 }
  0xc2   :  { %v300_v24 = vmul.f32 %v296_v22, %v1405_v23  ;;  %v301_v29 = vmul.f32 %v296_v22, %v1410_v8  ;;  %v225_v30 = vpop.permute.xlu0 %224  ;;  %v168_v22 = vperm.slane %v1280_v15, 3 }
  0xc3   :  { %v1416_v31 = vsel %vm1902_vm10, %v221_v59, %v225_v30  ;;  %v1420_v36 = vsel %vm1902_vm10, %v225_v30, %v221_v59  ;;  %v1446_v59 = vsel %vm1363_vm8, %v1202_v45, 0.0  ;;  %v169_v30 = vperm.slane %v1285_v16, 3 }
  0xc4   :  { %vm1471_vm14 = vcmp.gt.f32.partialorder %v168_v22, 0.5  ;;  %vm1525_vm10 = vcmp.gt.f32.partialorder %v190_v14, 0.5 }
  0xc5   :  { %v1944_v57 = vsel %vm1471_vm14, 4294967295, %v1943_v57  ;;  %vm1475_vm15 = vcmp.gt.f32.partialorder %v169_v30, 0.5 }
  0xc6   :  { %1945 = vst [vmem:[#allocation15_spill] sm:$0xff] %v1944_v57  ;;  %v1947_v34 = vsel %vm1475_vm15, 4294967295, %v1946_v34  ;;  %v1513_v32 = vsel %vm1475_vm15, %v1261_v10, 0.0  ;;  %v1951_v10 = vmov 0 }
  0xc7   :  { %1948 = vst [vmem:[#allocation16_spill] sm:$0xff] %v1947_v34  ;;  %v1952_v10 = vsel %vm1525_vm10, 4294967295, %v1951_v10 }
  0xc9   :  { %v246_v55 = vpop.permute.xlu1 %245  ;;  %v1441_v56 = vpop.permute.xlu2 %318 }
  0xca   :  { %v1426_v54 = vsel %vm1901_vm13, %v1287_v18, %v246_v55  ;;  %v1431_v37 = vsel %vm1901_vm13, %v246_v55, %v1287_v18  ;;  %v244_v40 = vpop.permute.xlu0 %243  ;;  %v1451_v18 = vsel %vm1367_vm9, %v1198_v44, 0.0 }
  0xcb   :  { %v1435_v43 = vsel %vm1901_vm13, %v240_v17, %v244_v40  ;;  %v1439_v26 = vsel %vm1901_vm13, %v244_v40, %v240_v17 }
  0xd1   :  { %v277_v50 = vpop.permute.xlu1 %276  ;;  %v1469_v35 = vpop.permute.xlu2 %337 }
  0xd2   :  { %v284_v4 = vmul.f32 %v277_v50, %v1446_v59  ;;  %v285_v7 = vmul.f32 %v277_v50, %v1451_v18  ;;  %v268_v45 = vpop.permute.xlu0 %267 }
  0xd3   :  { %v272_v17 = vmul.f32 %v268_v45, %v1458_v42  ;;  %v273_v44 = vmul.f32 %v268_v45, %v1463_v13  ;;  %v1482_v45 = vsel %vm1394_vm11, %v1222_v52, 0.0 }
  0xd4   :  { %v386_v55 = vadd.f32 %v284_v4, %v270_v27  ;;  %v387_v40 = vadd.f32 %v285_v7, %v271_v48  ;;  %v1487_v27 = vsel %vm1398_vm12, %v1218_v51, 0.0  ;;  %v1499_v4 = vsel %vm1475_vm15, %v1244_v62, 0.0 }
  0xd5   :  { %v388_v50 = vadd.f32 %v286_v5, %v272_v17  ;;  %v389_v58 = vadd.f32 %v287_v6, %v273_v44  ;;  %v1494_v6 = vsel %vm1471_vm14, %v1248_v63, 0.0  ;;  %v1508_v62 = vsel %vm1471_vm14, %v1265_v11, 0.0 }
  0xd9   :  { %v291_v33 = vpop.permute.xlu1 %290  ;;  %v361_v63 = vpop.permute.xlu2 %360 }
  0xda   :  { %v298_v48 = vmul.f32 %v291_v33, %v1482_v45  ;;  %v299_v5 = vmul.f32 %v291_v33, %v1487_v27  ;;  %v305_v52 = vpop.permute.xlu0 %304  ;;  %v189_v33 = vperm.slane %v1280_v15, 5 }
  0xdb   :  { %v312_v7 = vmul.f32 %v305_v52, %v1494_v6  ;;  %v313_v51 = vmul.f32 %v305_v52, %v1499_v4 }
  0xdc   :  { %vm1521_vm13 = vcmp.gt.f32.partialorder %v189_v33, 0.5  ;;  %v1553_v33 = vsel %vm1525_vm10, %v1305_v28, 0.0 }
  0xdd   :  { %v390_v17 = vadd.f32 %v312_v7, %v298_v48  ;;  %v391_v44 = vadd.f32 %v313_v51, %v299_v5  ;;  %v210_v48 = vperm.slane %v1280_v15, 6  ;;  %v232_v5 = vperm.slane %v1285_v16, 7 }
  0xdf   :  { %v402_v22 = vadd.f32 %v390_v17, %v386_v55  ;;  %v403_v30 = vadd.f32 %v391_v44, %v387_v40  ;;  %v211_v55 = vperm.slane %v1285_v16, 6  ;;  %v231_v40 = vperm.slane %v1280_v15, 7 }
  0xe0   :  { %vm1529_vm4 = vcmp.gt.f32.partialorder %v210_v48, 0.5  ;;  %v1957_v16 = vmov 0  ;;  %vm1541_vm1 = vcmp.gt.f32.partialorder %v232_v5, 0.5 }
  0xe1   :  { %v310_v41 = vpop.permute.xlu1 %309  ;;  %vm1533_vm7 = vcmp.gt.f32.partialorder %v211_v55, 0.5  ;;  %vm1537_vm3 = vcmp.gt.f32.partialorder %v231_v40, 0.5  ;;  %v327_v55 = vmul.f32 %v1441_v56, %v1030_v0  ;;  %v380_v40 = vpop.permute.xlu2 %379 }
  0xe2   :  { %v314_v52 = vmul.f32 %v310_v41, %v1508_v62  ;;  %v315_v7 = vmul.f32 %v310_v41, %v1513_v32  ;;  %v324_v51 = vpop.permute.xlu0 %323  ;;  %v1958_v16 = vsel %vm1537_vm3, 4294967295, %v1957_v16  ;;  %v1959_v41 = vmov 0 }
  0xe3   :  { %v1960_v41 = vsel %vm1541_vm1, 4294967295, %v1959_v41  ;;  %v1558_v48 = vsel %vm1537_vm3, %v1386_v9, 0.0  ;;  %v1573_v28 = vsel %vm1533_vm7, %v1345_v47, 0.0  ;;  %v326_v9 = vmul.f32 %v1441_v56, %v1035_v1  ;;  %v1588_v56 = vld [vmem:[%s1889_s1 + $0x10] ss:$0 sm:$0xff] }
  0xe4   :  { %v392_v11 = vadd.f32 %v314_v52, %v300_v24  ;;  %v393_v17 = vadd.f32 %v315_v7, %v301_v29  ;;  %v1548_v29 = vsel %vm1521_vm13, %v1301_v25, 0.0  ;;  %1961 = vst [vmem:[#allocation17_spill] sm:$0xff] %v1558_v48  ;;  %v1568_v25 = vsel %vm1529_vm4, %v1340_v46, 0.0 }
  0xe5   :  { %v368_v46 = vmul.f32 %v361_v63, %v1558_v48  ;;  %v1593_v48 = vsel %vm1521_vm13, %v1291_v19, 0.0  ;;  %v328_v19 = vmul.f32 %v324_v51, %v1051_v3  ;;  %vm1917_vm2 = vcmp.gt.f32.partialorder %v1588_v56, 0.5 }
  0xe6   :  { %v404_v14 = vadd.f32 %v392_v11, %v388_v50  ;;  %v405_v24 = vadd.f32 %v393_v17, %v389_v58  ;;  %v1563_v50 = vsel %vm1541_vm1, %v1390_v12, 0.0 }
  0xe7   :  { %v369_v7 = vmul.f32 %v361_v63, %v1563_v50  ;;  %v1598_v63 = vsel %vm1525_vm10, %v1295_v20, 0.0  ;;  %v329_v20 = vmul.f32 %v324_v51, %v1046_v2  ;;  %v342_v51 = vmul.f32 %v1469_v35, %v1593_v48 }
  0xe9   :  { %v333_v58 = vpop.permute.xlu1 %332 }
  0xea   :  { %v340_v12 = vmul.f32 %v333_v58, %v1548_v29  ;;  %v341_v5 = vmul.f32 %v333_v58, %v1553_v33  ;;  %v347_v52 = vpop.permute.xlu0 %346 }
  0xeb   :  { %v354_v11 = vmul.f32 %v347_v52, %v1568_v25  ;;  %v355_v47 = vmul.f32 %v347_v52, %v1573_v28 }
  0xec   :  { %v394_v17 = vadd.f32 %v340_v12, %v326_v9  ;;  %v395_v57 = vadd.f32 %v341_v5, %v327_v55  ;;  %v1603_v9 = vld [vmem:[%s1889_s1 + $0x18] ss:$0 sm:$0xff]  ;;  %s588_s1 = sld [smem:[#allocation3]] }
  0xed   :  { %v398_v21 = vadd.f32 %v368_v46, %v354_v11  ;;  %v399_v1 = vadd.f32 %v369_v7, %v355_v47  ;;  %vm1916_vm0 = vcmp.gt.f32.partialorder %v1603_v9, 0.5  ;;  %v396_v7 = vadd.f32 %v342_v51, %v328_v19 }
  0xee   :  { %v1655_v19 = vsel %vm1916_vm0, %v1439_v26, 0.0 }
  0xef   :  { %v406_v0 = vadd.f32 %v398_v21, %v394_v17  ;;  %v407_v58 = vadd.f32 %v399_v1, %v395_v57  ;;  %v1608_v21 = vsel %vm1529_vm4, %v1351_v49, 0.0  ;;  %v1613_v1 = vsel %vm1533_vm7, %v1355_v53, 0.0 }
  0xf0   :  { %v1622_v49 = vsel %vm1537_vm3, %v1416_v31, 0.0  ;;  %v1627_v53 = vsel %vm1541_vm1, %v1420_v36, 0.0  ;;  %v435_v31 = vpop.permute.xlu2 %434  ;;  %vm650_vm1 = vcmask 1042432  }
  0xf1   :  { %v352_v57 = vpop.permute.xlu1 %351  ;;  %v410_v55 = vadd.f32 %v406_v0, %v402_v22  ;;  %v411_v12 = vadd.f32 %v407_v58, %v403_v30  ;;  %v343_v0 = vmul.f32 %v1469_v35, %v1598_v63  ;;  %v1645_v35 = vsel %vm1916_vm0, %v1431_v37, 0.0 }
  0xf2   :  { %v356_v5 = vmul.f32 %v352_v57, %v1608_v21  ;;  %v357_v52 = vmul.f32 %v352_v57, %v1613_v1  ;;  %v366_v46 = vpop.permute.xlu0 %365  ;;  %v1640_v57 = vsel %vm1917_vm2, %v1426_v54, 0.0  ;;  %v385_v54 = vmul.f32 %v380_v40, %v1645_v35 }
  0xf3   :  { %v370_v22 = vmul.f32 %v366_v46, %v1622_v49  ;;  %v371_v30 = vmul.f32 %v366_v46, %v1627_v53  ;;  %v397_v11 = vadd.f32 %v343_v0, %v329_v20  ;;  %v1650_v46 = vsel %vm1917_vm2, %v1435_v43, 0.0 }
  0xf4   :  { %v384_v20 = vmul.f32 %v380_v40, %v1640_v57  ;;  %v442_v37 = vmul.f32 %v435_v31, %v1446_v59  ;;  %v443_v0 = vmul.f32 %v435_v31, %v1451_v18  ;;  %vm644_vm0 = vcmask 1040384  }
  0xf5   :  { %v400_v36 = vadd.f32 %v370_v22, %v356_v5  ;;  %v401_v47 = vadd.f32 %v371_v30, %v357_v52  ;;  %vm1919_vm2 = vcmask 1041408  }
  0xf7   :  { %v408_v17 = vadd.f32 %v400_v36, %v396_v7  ;;  %v409_v58 = vadd.f32 %v401_v47, %v397_v11 }
  0xf8   :  { %v454_v59 = vpop.permute.xlu2 %453 }
  0xf9   :  { %v412_v5 = vadd.f32 %v408_v17, %v404_v14  ;;  %v413_v52 = vadd.f32 %v409_v58, %v405_v24  ;;  %v375_v51 = vpop.permute.xlu1 %374 }
  0xfa   :  { %v382_v22 = vmul.f32 %v375_v51, %v1650_v46  ;;  %v383_v43 = vmul.f32 %v375_v51, %v1655_v19  ;;  %v421_v30 = vpop.permute.xlu0 %420 }
  0xfb   :  { %v416_v7 = vadd.f32 %v412_v5, %v384_v20  ;;  %v1663_v11 = vadd.f32 %v413_v52, %v385_v54  ;;  %v428_v26 = vmul.f32 %v421_v30, %v1328_v38  ;;  %v429_v36 = vmul.f32 %v421_v30, %v1333_v39 }
  0xfc   :  { %v414_v40 = vadd.f32 %v410_v55, %v382_v22  ;;  %v1667_v14 = vadd.f32 %v411_v12, %v383_v43  ;;  %v459_v30 = vmul.f32 %v454_v59, %v1410_v8  ;;  %v1964_v8 = vld [vmem:[#allocation17_spill] sm:$0xff] }
  0xfd   :  { %v544_v24 = vadd.f32 %v442_v37, %v428_v26  ;;  %v545_v47 = vadd.f32 %v443_v0, %v429_v36 }
 0x100   :  { %v477_v52 = vpop.permute.xlu2 %476 }
 0x101   :  { %v426_v17 = vpop.permute.xlu1 %425 }
 0x102   :  { %v430_v18 = vmul.f32 %v426_v17, %v1458_v42  ;;  %v431_v31 = vmul.f32 %v426_v17, %v1463_v13  ;;  %v440_v58 = vpop.permute.xlu0 %439 }
 0x103   :  { %v444_v20 = vmul.f32 %v440_v58, %v1375_v60  ;;  %v445_v54 = vmul.f32 %v440_v58, %v1380_v61  ;;  %v458_v61 = vmul.f32 %v454_v59, %v1405_v23 }
 0x105   :  { %v546_v5 = vadd.f32 %v444_v20, %v430_v18  ;;  %v547_v38 = vadd.f32 %v445_v54, %v431_v31  ;;  %v1963_v20 = vld [vmem:[#allocation6_spill] sm:$0xff] }
 0x106   :  { %v485_v23 = vmul.f32 %v477_v52, %v1963_v20 }
 0x108   :  { %v519_v26 = vpop.permute.xlu2 %518 }
 0x109   :  { %v449_v39 = vpop.permute.xlu1 %448  ;;  %v526_v59 = vmul.f32 %v519_v26, %v1964_v8 }
 0x10a   :  { %v456_v55 = vmul.f32 %v449_v39, %v1482_v45  ;;  %v457_v12 = vmul.f32 %v449_v39, %v1487_v27  ;;  %v463_v51 = vpop.permute.xlu0 %462 }
 0x10b   :  { %v470_v37 = vmul.f32 %v463_v51, %v1494_v6  ;;  %v471_v42 = vmul.f32 %v463_v51, %v1499_v4 }
 0x10d   :  { %v548_v0 = vadd.f32 %v470_v37, %v456_v55  ;;  %v549_v13 = vadd.f32 %v471_v42, %v457_v12  ;;  %v576_v37 = vrot.slane %v414_v40, 4 }
 0x10f   :  { %v560_v22 = vadd.f32 %v548_v0, %v544_v24  ;;  %v561_v43 = vadd.f32 %v549_v13, %v545_v47  ;;  %v1962_v47 = vld [vmem:[#allocation7_spill] sm:$0xff]  ;;  %v582_v13 = vrot.slane %v1667_v14, 4 }
 0x110   :  { %v484_v58 = vmul.f32 %v477_v52, %v1962_v47  ;;  %v618_v52 = vrot.slane %v1663_v11, 4 }
 0x111   :  { %v468_v60 = vpop.permute.xlu1 %467 }
 0x112   :  { %v472_v36 = vmul.f32 %v468_v60, %v1508_v62  ;;  %v473_v45 = vmul.f32 %v468_v60, %v1513_v32  ;;  %v491_v27 = vpop.permute.xlu0 %490  ;;  %v527_v62 = vmul.f32 %v519_v26, %v1563_v50 }
 0x113   :  { %v498_v4 = vmul.f32 %v491_v27, %v1548_v29  ;;  %v499_v24 = vmul.f32 %v491_v27, %v1553_v33  ;;  %v612_v33 = vrot.slane %v416_v7, 4 }
 0x114   :  { %v550_v17 = vadd.f32 %v472_v36, %v458_v61  ;;  %v551_v18 = vadd.f32 %v473_v45, %v459_v30 }
 0x115   :  { %v553_v12 = vadd.f32 %v499_v24, %v485_v23  ;;  %v613_v61 = vadd.f32 %v612_v33, %v416_v7  ;;  %v619_v7 = vadd.f32 %v618_v52, %v1663_v11 }
 0x116   :  { %v562_v6 = vadd.f32 %v550_v17, %v546_v5  ;;  %v563_v31 = vadd.f32 %v551_v18, %v547_v38  ;;  %v510_v5 = vpop.permute.xlu2 %509  ;;  %v552_v38 = vadd.f32 %v498_v4, %v484_v58 }
 0x117   :  { %v514_v17 = vmul.f32 %v510_v5, %v1608_v21  ;;  %v515_v18 = vmul.f32 %v510_v5, %v1613_v1  ;;  %v614_v20 = vrot.slane %v613_v61, 2  ;;  %v620_v21 = vrot.slane %v619_v7, 2 }
 0x119   :  { %v505_v54 = vpop.permute.xlu1 %504 }
 0x11a   :  { %v512_v32 = vmul.f32 %v505_v54, %v1568_v25  ;;  %v513_v39 = vmul.f32 %v505_v54, %v1573_v28  ;;  %v482_v55 = vpop.permute.xlu0 %481  ;;  %v577_v25 = vadd.f32 %v576_v37, %v414_v40  ;;  %v583_v40 = vadd.f32 %v582_v13, %v1667_v14 }
 0x11b   :  { %v486_v28 = vmul.f32 %v482_v55, %v1051_v3  ;;  %v487_v26 = vmul.f32 %v482_v55, %v1046_v2 }
 0x11c   :  { %v556_v29 = vadd.f32 %v526_v59, %v512_v32  ;;  %v557_v51 = vadd.f32 %v527_v62, %v513_v39  ;;  %v578_v47 = vrot.slane %v577_v25, 2  ;;  %v584_v23 = vrot.slane %v583_v40, 2 }
 0x11e   :  { %v564_v42 = vadd.f32 %v556_v29, %v552_v38  ;;  %v565_v0 = vadd.f32 %v557_v51, %v553_v12  ;;  %v579_v59 = vadd.f32 %v578_v47, %v577_v25  ;;  %v585_v39 = vadd.f32 %v584_v23, %v583_v40 }
 0x11f   :  { %v615_v38 = vadd.f32 %v614_v20, %v613_v61  ;;  %v621_v12 = vadd.f32 %v620_v21, %v619_v7 }
 0x120   :  { %v568_v60 = vadd.f32 %v564_v42, %v560_v22  ;;  %v569_v50 = vadd.f32 %v565_v0, %v561_v43 }
 0x121   :  { %v496_v30 = vpop.permute.xlu1 %495  ;;  %v616_v42 = vrot.slane %v615_v38, 1  ;;  %v622_v0 = vrot.slane %v621_v12, 1 }
 0x122   :  { %v500_v36 = vmul.f32 %v496_v30, %v1593_v48  ;;  %v501_v45 = vmul.f32 %v496_v30, %v1598_v63  ;;  %v524_v27 = vpop.permute.xlu0 %523  ;;  %v538_v48 = vpop.permute.xlu2 %537 }
 0x123   :  { %v528_v4 = vmul.f32 %v524_v27, %v1622_v49  ;;  %v529_v22 = vmul.f32 %v524_v27, %v1627_v53  ;;  %v542_v1 = vmul.f32 %v538_v48, %v1640_v57  ;;  %v543_v49 = vmul.f32 %v538_v48, %v1645_v35 }
 0x124   :  { %v554_v3 = vadd.f32 %v500_v36, %v486_v28  ;;  %v555_v43 = vadd.f32 %v501_v45, %v487_v26  ;;  %v617_v45 = vadd.f32 %v616_v42, %v615_v38  ;;  %v623_v27 = vadd.f32 %v622_v0, %v621_v12 }
 0x125   :  { %v558_v2 = vadd.f32 %v528_v4, %v514_v17  ;;  %v559_v24 = vadd.f32 %v529_v22, %v515_v18  ;;  %v589_v4 = vstv %s588_s1 }
 0x127   :  { %v566_v63 = vadd.f32 %v558_v2, %v554_v3  ;;  %v567_v58 = vadd.f32 %v559_v24, %v555_v43  ;;  %v607_v2 = vstv %s925_s27 }
 0x129   :  { %v570_v53 = vadd.f32 %v566_v63, %v562_v6  ;;  %v571_v54 = vadd.f32 %v567_v58, %v563_v31  ;;  %v533_v11 = vpop.permute.xlu1 %532  ;;  %v580_v6 = vrot.slane %v579_v59, 1  ;;  %v624_v63 = vadd.f32 %v617_v45, %v589_v4 }
 0x12a   :  { %v540_v14 = vmul.f32 %v533_v11, %v1650_v46  ;;  %v541_v8 = vmul.f32 %v533_v11, %v1655_v19  ;;  %v586_v46 = vrot.slane %v585_v39, 1  ;;  %v625_v58 = vadd.f32 %v623_v27, %v589_v4 }
 0x12b   :  { %v574_v62 = vadd.f32 %v570_v53, %v542_v1  ;;  %v575_v32 = vadd.f32 %v571_v54, %v543_v49  ;;  %v581_v61 = vadd.f32 %v580_v6, %v579_v59  ;;  %v86_v6 = vld [vmem:[%s1891_s3 + $0x14] sm:$0xf] }
 0x12c   :  { %v572_v55 = vadd.f32 %v568_v60, %v540_v14  ;;  %v573_v5 = vadd.f32 %v569_v50, %v541_v8  ;;  %v587_v28 = vadd.f32 %v586_v46, %v585_v39  ;;  %v626_v14 = vmax.f32 %v624_v63, 0.0  ;;  %v88_v46 = vld [vmem:[%s1891_s3 + $0x1c] sm:$0xf] }
 0x12d   :  { %v628_v29 = vrot.slane %v574_v62, 4  ;;  %v634_v51 = vrot.slane %v575_v32, 4  ;;  %v590_v40 = vadd.f32 %v589_v4, %v581_v61  ;;  %v627_v8 = vmax.f32 %v625_v58, 0.0 }
 0x12e   :  { %v594_v57 = vrot.slane %v572_v55, 4  ;;  %v600_v35 = vrot.slane %v573_v5, 4  ;;  %v591_v24 = vadd.f32 %v589_v4, %v587_v28 }
 0x12f   :  { %v629_v31 = vadd.f32 %v628_v29, %v574_v62  ;;  %v635_v33 = vadd.f32 %v634_v51, %v575_v32  ;;  %v592_v49 = vmax.f32 %v590_v40, 0.0  ;;  %v81_v29 = vld [vmem:[%s1891_s3] sm:$0xf]  ;;  %v83_v51 = vld [vmem:[%s1891_s3 + $0x8] sm:$0xf] }
 0x130   :  { %v595_v37 = vadd.f32 %v594_v57, %v572_v55  ;;  %v601_v19 = vadd.f32 %v600_v35, %v573_v5  ;;  %v593_v53 = vmax.f32 %v591_v24, 0.0  ;;  %v84_v57 = vld [vmem:[%s1891_s3 + $0xc] sm:$0xf]  ;;  %v82_v35 = vld [vmem:[%s1891_s3 + $0x4] sm:$0xf] }
 0x131   :  { %v630_v52 = vrot.slane %v629_v31, 2  ;;  %v636_v13 = vrot.slane %v635_v33, 2 }
 0x132   :  { %v596_v60 = vrot.slane %v595_v37, 2  ;;  %v602_v50 = vrot.slane %v601_v19, 2 }
 0x133   :  { %v631_v25 = vadd.f32 %v630_v52, %v629_v31  ;;  %v637_v30 = vadd.f32 %v636_v13, %v635_v33  ;;  %v87_v31 = vld [vmem:[%s1891_s3 + $0x18] sm:$0xf]  ;;  %v85_v33 = vld [vmem:[%s1891_s3 + $0x10] sm:$0xf] }
 0x134   :  { %v597_v26 = vadd.f32 %v596_v60, %v595_v37  ;;  %v603_v36 = vadd.f32 %v602_v50, %v601_v19  ;;  %v89_v37 = vld [vmem:[%s1891_s3 + $0x20] sm:$0xf] }
 0x135   :  { %v632_v17 = vrot.slane %v631_v25, 1  ;;  %v638_v18 = vrot.slane %v637_v30, 1 }
 0x136   :  { %v598_v22 = vrot.slane %v597_v26, 1  ;;  %v604_v7 = vrot.slane %v603_v36, 1 }
 0x137   :  { %v633_v3 = vadd.f32 %v632_v17, %v631_v25  ;;  %v639_v43 = vadd.f32 %v638_v18, %v637_v30 }
 0x138   :  { %v599_v48 = vadd.f32 %v598_v22, %v597_v26  ;;  %v605_v47 = vadd.f32 %v604_v7, %v603_v36  ;;  %v1965_v22 = vld [vmem:[#allocation8_spill] sm:$0xff] }
 0x139   :  { %v640_v23 = vadd.f32 %v633_v3, %v607_v2  ;;  %v641_v1 = vadd.f32 %v639_v43, %v607_v2  ;;  %vm1972_vm10 = vcmp.lt.s32.totalorder %v1965_v22, 16 }
 0x13a   :  { %v608_v20 = vadd.f32 %v607_v2, %v599_v48  ;;  %v609_v21 = vadd.f32 %v607_v2, %v605_v47 }
 0x13b   :  { %v642_v59 = vmax.f32 %v640_v23, 0.0  ;;  %v643_v62 = vmax.f32 %v641_v1, 0.0 }
 0x13c   :  { %v610_v54 = vmax.f32 %v608_v20, 0.0  ;;  %v611_v11 = vmax.f32 %v609_v21, 0.0 }
 0x13e   :  { %v645_v32 = vsel %vm644_vm0, %v592_v49, %v610_v54  ;;  %v646_v39 = vsel %vm644_vm0, %v593_v53, %v611_v11  ;;  %vm1966_vm0 = vcmp.lt.s32.totalorder %v1965_v22, 17 }
 0x13f   :  { %v648_v55 = vsel %vm1919_vm2, %v645_v32, %v626_v14  ;;  %v649_v5 = vsel %vm1919_vm2, %v646_v39, %v627_v8  ;;  %vm1970_vm2 = vcmp.lt.s32.totalorder %v1965_v22, 15 }
 0x140   :  { %v1707_v38 = vsel %vm650_vm1, %v649_v5, %v643_v62  ;;  %v1709_v12 = vsel %vm650_vm1, %v648_v55, %v642_v59  ;;  %vm1967_vm1 = vmmov %vm1966_vm0 }
 0x141   :  { %655 = vrot.lane.b32.xlu1 %v1707_v38, %s980_s29  ;;  %661 = vrot.lane.b32.xlu2 %v1709_v12, %s981_s4  ;;  %vm1971_vm3 = vmmov %vm1970_vm2 }
 0x142   :  { %653 = vrot.lane.b32.xlu0 %v1709_v12, %s980_s29 }
 0x149   :  { %669 = vrot.lane.b32.xlu1 %v1709_v12, %s982_s10  ;;  %671 = vrot.lane.b32.xlu2 %v1707_v38, %s982_s10 }
 0x14a   :  { %663 = vrot.lane.b32.xlu0 %v1707_v38, %s981_s4 }
 0x151   :  { %679 = vrot.lane.b32.xlu1 %v1707_v38, %s983_s11  ;;  %685 = vrot.lane.b32.xlu2 %v1709_v12, %s984_s12 }
 0x152   :  { %677 = vrot.lane.b32.xlu0 %v1709_v12, %s983_s11 }
 0x159   :  { %693 = vrot.lane.b32.xlu1 %v1709_v12, %s986_s13  ;;  %695 = vrot.lane.b32.xlu2 %v1707_v38, %s986_s13 }
 0x15a   :  { %687 = vrot.lane.b32.xlu0 %v1707_v38, %s984_s12 }
 0x161   :  { %703 = vrot.lane.b32.xlu1 %v1707_v38, %s987_s14  ;;  %719 = vperm.xlu2 %940, %v81_v29  }
 0x162   :  { %701 = vrot.lane.b32.xlu0 %v1709_v12, %s987_s14 }
 0x169   :  { %733 = vperm.xlu1 %942, %v83_v51   ;;  %740 = vperm.xlu2 %940, %v84_v57  }
 0x16a   :  { %726 = vperm.xlu0 %941, %v82_v35  }
 0x171   :  { %754 = vperm.xlu1 %942, %v86_v6   ;;  %761 = vperm.xlu2 %940, %v87_v31  }
 0x172   :  { %747 = vperm.xlu0 %941, %v85_v33  }
 0x179   :  { %709 = vrot.lane.b32.xlu1 %v1709_v12, %s988_s15  ;;  %711 = vrot.lane.b32.xlu2 %v1707_v38, %s988_s15 }
 0x17a   :  { %768 = vperm.xlu0 %941, %v88_v46  }
 0x182   :  { %775 = vperm.xlu0 %941, %v89_v37  }
 0x19b   :  { %v662_v19 = vpop.permute.xlu2 %661 }
 0x1a3   :  { %v672_v0 = vpop.permute.xlu2 %671 }
 0x1ab   :  { %v686_v50 = vpop.permute.xlu2 %685 }
 0x1b3   :  { %v656_v42 = vpop.permute.xlu1 %655  ;;  %v696_v30 = vpop.permute.xlu2 %695 }
 0x1b4   :  { %v654_v52 = vpop.permute.xlu0 %653 }
 0x1b5   :  { %v657_v7 = vsel %vm1966_vm0, %v654_v52, %v656_v42  ;;  %v658_v40 = vsel %vm1967_vm1, %v656_v42, %v654_v52  ;;  %vm1973_vm0 = vmmov %vm1972_vm10  ;;  %vm1974_vm1 = vcmp.lt.s32.totalorder %v1965_v22, 1 }
 0x1b6   :  { %v659_v43 = vsel %vm1316_vm5, %v658_v40, 0.0  ;;  %v660_v24 = vsel %vm1320_vm6, %v657_v7, 0.0  ;;  %vm1975_vm5 = vmmov %vm1974_vm1  ;;  %vm1976_vm6 = vcmp.lt.s32.totalorder %v1965_v22, 113 }
 0x1bb   :  { %v670_v13 = vpop.permute.xlu1 %669  ;;  %v720_v36 = vpop.permute.xlu2 %719 }
 0x1bc   :  { %v664_v60 = vpop.permute.xlu0 %663  ;;  %v673_v48 = vsel %vm1970_vm2, %v670_v13, %v672_v0  ;;  %v674_v47 = vsel %vm1971_vm3, %v672_v0, %v670_v13  ;;  %vm1977_vm2 = vmmov %vm1976_vm6  ;;  %v722_v54 = vmul.f32 %v720_v36, %v659_v43  ;;  %v723_v11 = vmul.f32 %v720_v36, %v660_v24 }
 0x1bd   :  { %v665_v63 = vsel %vm1972_vm10, %v662_v19, %v664_v60  ;;  %v666_v58 = vsel %vm1973_vm0, %v664_v60, %v662_v19  ;;  %vm1978_vm3 = vcmp.lt.s32.totalorder %v1965_v22, 127  ;;  %v675_v32 = vsel %vm1394_vm11, %v674_v47, 0.0 }
 0x1be   :  { %vm1979_vm10 = vmmov %vm1978_vm3  ;;  %v676_v55 = vsel %vm1398_vm12, %v673_v48, 0.0  ;;  %v667_v29 = vsel %vm1363_vm8, %v666_v58, 0.0  ;;  %v668_v57 = vsel %vm1367_vm9, %v665_v63, 0.0  ;;  %vm1986_vm11 = vcmp.lt.s32.totalorder %v1965_v22, 112 }
 0x1bf   :  { %vm1987_vm8 = vmmov %vm1986_vm11  ;;  %vm1988_vm9 = vnez %v1952_v10  ;;  %vm1991_vm12 = vcmp.lt.s32.totalorder %v1965_v22, 111  ;;  %vm1995_vm0 = vcmask 1041408  }
 0x1c3   :  { %v680_v61 = vpop.permute.xlu1 %679  ;;  %v741_v18 = vpop.permute.xlu2 %740 }
 0x1c4   :  { %v678_v25 = vpop.permute.xlu0 %677 }
 0x1c5   :  { %v681_v23 = vsel %vm1974_vm1, %v678_v25, %v680_v61  ;;  %v682_v1 = vsel %vm1975_vm5, %v680_v61, %v678_v25  ;;  %vm1996_vm1 = vmmov %vm1995_vm0 }
 0x1c6   :  { %v683_v6 = vsel %vm1471_vm14, %v682_v1, 0.0  ;;  %v684_v33 = vsel %vm1475_vm15, %v681_v23, 0.0  ;;  %vm1993_vm14 = vcmp.gt.f32.partialorder %v1588_v56, 0.5  ;;  %vm1994_vm15 = vcmp.gt.f32.partialorder %v1603_v9, 0.5  ;;  %vm1997_vm5 = vmmov %vm1995_vm0 }
 0x1cb   :  { %v694_v28 = vpop.permute.xlu1 %693  ;;  %v762_v14 = vpop.permute.xlu2 %761 }
 0x1cc   :  { %v688_v26 = vpop.permute.xlu0 %687  ;;  %v697_v49 = vsel %vm1976_vm6, %v694_v28, %v696_v30  ;;  %v698_v53 = vsel %vm1977_vm2, %v696_v30, %v694_v28  ;;  %v743_v28 = vmul.f32 %v741_v18, %v683_v6  ;;  %vm1998_vm6 = vmmov %vm1995_vm0 }
 0x1cd   :  { %v689_v8 = vsel %vm1978_vm3, %v686_v50, %v688_v26  ;;  %v690_v59 = vsel %vm1979_vm10, %v688_v26, %v686_v50  ;;  %v699_v46 = vsel %vm1529_vm4, %v697_v49, 0.0  ;;  %v700_v37 = vsel %vm1533_vm7, %v698_v53, 0.0 }
 0x1ce   :  { %v691_v0 = vsel %vm1521_vm13, %v689_v8, 0.0  ;;  %v692_v52 = vsel %vm1988_vm9, %v690_v59, 0.0  ;;  %v744_v26 = vmul.f32 %v741_v18, %v684_v33  ;;  %vm1989_vm4 = vnez %v1958_v16  ;;  %vm1992_vm13 = vmmov %vm1991_vm12 }
 0x1cf   :  { %vm1990_vm7 = vnez %v1960_v41 }
 0x1d3   :  { %v704_v45 = vpop.permute.xlu1 %703  ;;  %v712_v48 = vpop.permute.xlu2 %711 }
 0x1d4   :  { %v702_v27 = vpop.permute.xlu0 %701 }
 0x1d5   :  { %v705_v19 = vsel %vm1986_vm11, %v702_v27, %v704_v45  ;;  %v706_v42 = vsel %vm1987_vm8, %v704_v45, %v702_v27  ;;  %v764_v45 = vmul.f32 %v762_v14, %v699_v46  ;;  %v765_v27 = vmul.f32 %v762_v14, %v700_v37 }
 0x1d6   :  { %v707_v36 = vsel %vm1989_vm4, %v705_v19, 0.0  ;;  %v708_v44 = vsel %vm1990_vm7, %v706_v42, 0.0 }
 0x1db   :  { %v734_v17 = vpop.permute.xlu1 %733 }
 0x1dc   :  { %v727_v4 = vpop.permute.xlu0 %726  ;;  %v736_v13 = vmul.f32 %v734_v17, %v675_v32  ;;  %v737_v60 = vmul.f32 %v734_v17, %v676_v55 }
 0x1dd   :  { %v729_v50 = vmul.f32 %v727_v4, %v667_v29  ;;  %v730_v34 = vmul.f32 %v727_v4, %v668_v57 }
 0x1de   :  { %v782_v4 = vadd.f32 %v743_v28, %v736_v13  ;;  %v783_v40 = vadd.f32 %v744_v26, %v737_v60 }
 0x1df   :  { %v780_v3 = vadd.f32 %v729_v50, %v722_v54  ;;  %v781_v43 = vadd.f32 %v730_v34, %v723_v11  ;;  %v811_v50 = vstv %s1893_s5 }
 0x1e1   :  { %v788_v58 = vadd.f32 %v782_v4, %v780_v3 }
 0x1e3   :  { %v755_v20 = vpop.permute.xlu1 %754 }
 0x1e4   :  { %v748_v21 = vpop.permute.xlu0 %747  ;;  %v757_v61 = vmul.f32 %v755_v20, %v691_v0  ;;  %v758_v25 = vmul.f32 %v755_v20, %v692_v52  ;;  %v789_v20 = vadd.f32 %v783_v40, %v781_v43 }
 0x1e5   :  { %v750_v15 = vmul.f32 %v748_v21, %v1709_v12  ;;  %v751_v30 = vmul.f32 %v748_v21, %v1707_v38 }
 0x1e7   :  { %v784_v2 = vadd.f32 %v757_v61, %v750_v15  ;;  %v785_v38 = vadd.f32 %v758_v25, %v751_v30 }
 0x1eb   :  { %v710_v12 = vpop.permute.xlu1 %709 }
 0x1ec   :  { %v769_v10 = vpop.permute.xlu0 %768  ;;  %v713_v16 = vsel %vm1991_vm12, %v710_v12, %v712_v48  ;;  %v714_v41 = vsel %vm1992_vm13, %v712_v48, %v710_v12 }
 0x1ed   :  { %v771_v17 = vmul.f32 %v769_v10, %v707_v36  ;;  %v772_v7 = vmul.f32 %v769_v10, %v708_v44  ;;  %v715_v21 = vsel %vm1993_vm14, %v713_v16, 0.0  ;;  %v716_v23 = vsel %vm1994_vm15, %v714_v41, 0.0 }
 0x1ef   :  { %v786_v24 = vadd.f32 %v771_v17, %v764_v45  ;;  %v787_v18 = vadd.f32 %v772_v7, %v765_v27 }
 0x1f1   :  { %v790_v47 = vadd.f32 %v786_v24, %v784_v2  ;;  %v791_v63 = vadd.f32 %v787_v18, %v785_v38 }
 0x1f3   :  { %v792_v49 = vadd.f32 %v790_v47, %v788_v58  ;;  %v793_v53 = vadd.f32 %v791_v63, %v789_v20 }
 0x1f4   :  { %v776_v1 = vpop.permute.xlu0 %775 }
 0x1f5   :  { %v778_v54 = vmul.f32 %v776_v1, %v715_v21  ;;  %v779_v11 = vmul.f32 %v776_v1, %v716_v23 }
 0x1f7   :  { %v794_v14 = vadd.f32 %v792_v49, %v778_v54  ;;  %v795_v8 = vadd.f32 %v793_v53, %v779_v11 }
 0x1f9   :  { %v796_v22 = vsel %vm1995_vm0, %v794_v14, 0.0  ;;  %v803_v59 = vsel %vm1996_vm1, %v795_v8, 0.0  ;;  %v856_v62 = vrot.slane %v794_v14, 2  ;;  %v857_v32 = vrot.slane %v795_v8, 2 }
 0x1fa   :  { %v797_v39 = vrot.slane %v796_v22, 4  ;;  %v804_v55 = vrot.slane %v803_v59, 4 }
 0x1fb   :  { %v860_v56 = vsel %vm1997_vm5, %v856_v62, 0.0  ;;  %v867_v9 = vsel %vm1998_vm6, %v857_v32, 0.0 }
 0x1fc   :  { %v798_v5 = vadd.f32 %v797_v39, %v796_v22  ;;  %v805_v29 = vadd.f32 %v804_v55, %v803_v59  ;;  %v861_v51 = vrot.slane %v860_v56, 4  ;;  %v868_v57 = vrot.slane %v867_v9, 4 }
 0x1fe   :  { %v799_v35 = vrot.slane %v798_v5, 2  ;;  %v806_v6 = vrot.slane %v805_v29, 2  ;;  %v862_v31 = vadd.f32 %v861_v51, %v860_v56  ;;  %v869_v33 = vadd.f32 %v868_v57, %v867_v9 }
 0x200   :  { %v800_v46 = vadd.f32 %v799_v35, %v798_v5  ;;  %v807_v37 = vadd.f32 %v806_v6, %v805_v29  ;;  %v863_v19 = vrot.slane %v862_v31, 2  ;;  %v870_v42 = vrot.slane %v869_v33, 2 }
 0x202   :  { %v801_v0 = vrot.slane %v800_v46, 1  ;;  %v808_v52 = vrot.slane %v807_v37, 1  ;;  %v864_v13 = vadd.f32 %v863_v19, %v862_v31  ;;  %v871_v60 = vadd.f32 %v870_v42, %v869_v33 }
 0x204   :  { %v802_v34 = vadd.f32 %v801_v0, %v800_v46  ;;  %v809_v61 = vadd.f32 %v808_v52, %v807_v37  ;;  %v865_v25 = vrot.slane %v864_v13, 1  ;;  %v872_v15 = vrot.slane %v871_v60, 1  ;;  %v961_v37 = vld [vmem:[%s1888_s0] sm:$0xff]  ;;  %v962_v0 = vld [vmem:[%s1888_s0 + $0x8] sm:$0xff] }
 0x206   :  { %v812_v30 = vadd.f32 %v811_v50, %v802_v34  ;;  %v813_v28 = vadd.f32 %v811_v50, %v809_v61  ;;  %v866_v26 = vadd.f32 %v865_v25, %v864_v13  ;;  %v873_v36 = vadd.f32 %v872_v15, %v871_v60 }
 0x208   :  { %v926_v44 = vmul.f32 -1.442695, %v812_v30  ;;  %v927_v10 = vmul.f32 -1.442695, %v813_v28  ;;  %v874_v45 = vadd.f32 %v866_v26, %v811_v50  ;;  %v875_v27 = vadd.f32 %v873_v36, %v811_v50  ;;  %v963_v30 = vld [vmem:[%s1888_s0 + $0x10] sm:$0xff]  ;;  %v964_v26 = vld [vmem:[%s1888_s0 + $0x18] sm:$0xff] }
 0x20a   :  { %945 = vpow2.f32 %v926_v44  ;;  %v928_v17 = vmul.f32 -1.442695, %v874_v45  ;;  %v929_v7 = vmul.f32 -1.442695, %v875_v27 }
 0x20b   :  { %947 = vpow2.f32 %v927_v10 }
 0x20c   :  { %949 = vpow2.f32 %v928_v17 }
 0x20d   :  { %951 = vpow2.f32 %v929_v7 }
 0x210   :  { %v946_v4 = vpop.eup %945 }
 0x211   :  { %v948_v40 = vpop.eup %947  ;;  %v820_v3 = vadd.f32 1.0, %v946_v4 }
 0x212   :  { %v950_v43 = vpop.eup %949  ;;  %v821_v12 = vadd.f32 1.0, %v948_v40 }
 0x213   :  { %v952_v2 = vpop.eup %951  ;;  %953 = vrcp.f32 %v820_v3  ;;  %v882_v38 = vadd.f32 1.0, %v950_v43  ;;  %v831_v48 = vand.u32 2147483647, %v820_v3  ;;  %v833_v47 = vand.u32 2147483648, %v820_v3 }
 0x214   :  { %955 = vrcp.f32 %v821_v12  ;;  %v1843_v24 = vadd.f32 1.0, %v952_v2  ;;  %v846_v58 = vand.u32 2147483647, %v821_v12  ;;  %v848_v21 = vand.u32 2147483648, %v821_v12 }
 0x215   :  { %957 = vrcp.f32 %v882_v38  ;;  %vm827_vm2 = vweird.f32 %v820_v3  ;;  %vm1846_vm3 = vcmp.eq.f32.partialorder %v831_v48, 8.507059e+37  ;;  %vm842_vm10 = vweird.f32 %v821_v12 }
 0x216   :  { %959 = vrcp.f32 %v1843_v24  ;;  %v834_v11 = vor.u32 1.1754944e-38, %v833_v47  ;;  %vm1850_vm9 = vcmp.eq.f32.partialorder %v846_v58, 8.507059e+37  ;;  %v849_v32 = vor.u32 1.1754944e-38, %v848_v21 }
 0x217   :  { %v893_v55 = vand.u32 2147483647, %v882_v38  ;;  %v895_v9 = vand.u32 2147483648, %v882_v38  ;;  %v908_v29 = vand.u32 2147483647, %v1843_v24  ;;  %v910_v35 = vand.u32 2147483648, %v1843_v24 }
 0x218   :  { %vm889_vm14 = vweird.f32 %v882_v38  ;;  %vm904_vm0 = vweird.f32 %v1843_v24 }
 0x219   :  { %v954_v18 = vpop.eup %953  ;;  %v896_v13 = vor.u32 1.1754944e-38, %v895_v9  ;;  %vm894_vm1 = vcmp.eq.f32.partialorder %v893_v55, 8.507059e+37  ;;  %v911_v34 = vor.u32 1.1754944e-38, %v910_v35  ;;  %vm909_vm6 = vcmp.eq.f32.partialorder %v908_v29, 8.507059e+37 }
 0x21a   :  { %v956_v16 = vpop.eup %955  ;;  %v823_v41 = vmul.f32 %v954_v18, %v820_v3  ;;  %vm828_vm11 = vweird.f32 %v954_v18 }
 0x21b   :  { %v838_v63 = vmul.f32 %v956_v16, %v821_v12  ;;  %v958_v23 = vpop.eup %957  ;;  %vm843_vm8 = vweird.f32 %v956_v16  ;;  %vm829_vm4 = vmor %vm827_vm2, %vm828_vm11 }
 0x21c   :  { %v824_v20 = vsub.f32 1.0, %v823_v41  ;;  %v960_v53 = vpop.eup %959  ;;  %v885_v14 = vmul.f32 %v958_v23, %v882_v38  ;;  %vm844_vm7 = vmor %vm842_vm10, %vm843_vm8  ;;  %vm890_vm12 = vweird.f32 %v958_v23 }
 0x21d   :  { %v839_v49 = vsub.f32 1.0, %v838_v63  ;;  %v900_v59 = vmul.f32 %v960_v53, %v1843_v24  ;;  %vm905_vm13 = vweird.f32 %v960_v53  ;;  %vm891_vm15 = vmor %vm889_vm14, %vm890_vm12 }
 0x21e   :  { %v825_v54 = vmul.f32 %v954_v18, %v824_v20  ;;  %v886_v39 = vsub.f32 1.0, %v885_v14  ;;  %vm906_vm5 = vmor %vm904_vm0, %vm905_vm13 }
 0x21f   :  { %v840_v8 = vmul.f32 %v956_v16, %v839_v49  ;;  %v901_v5 = vsub.f32 1.0, %v900_v59 }
 0x220   :  { %v826_v62 = vadd.f32 %v954_v18, %v825_v54  ;;  %v887_v57 = vmul.f32 %v958_v23, %v886_v39 }
 0x221   :  { %v841_v56 = vadd.f32 %v956_v16, %v840_v8  ;;  %v902_v33 = vmul.f32 %v960_v53, %v901_v5 }
 0x222   :  { %v830_v51 = vsel %vm829_vm4, %v954_v18, %v826_v62  ;;  %v888_v42 = vadd.f32 %v958_v23, %v887_v57 }
 0x223   :  { %v835_v6 = vsel %vm1846_vm3, %v834_v11, %v830_v51  ;;  %v845_v31 = vsel %vm844_vm7, %v956_v16, %v841_v56  ;;  %v903_v60 = vadd.f32 %v960_v53, %v902_v33 }
 0x224   :  { %v850_v46 = vsel %vm1850_vm9, %v849_v32, %v845_v31  ;;  %v852_v19 = vmul.f32 %v961_v37, %v835_v6  ;;  %v892_v50 = vsel %vm891_vm15, %v958_v23, %v888_v42 }
 0x225   :  { %v853_v52 = vmul.f32 %v962_v0, %v850_v46  ;;  %v897_v61 = vsel %vm894_vm1, %v896_v13, %v892_v50  ;;  %v907_v25 = vsel %vm906_vm5, %v960_v53, %v903_v60 }
 0x226   :  { %916 = vst [vmem:[%s1894_s6] sm:$0xff] %v852_v19  ;;  %v912_v15 = vsel %vm909_vm6, %v911_v34, %v907_v25  ;;  %v914_v28 = vmul.f32 %v963_v30, %v897_v61 }
 0x227   :  { %917 = vst [vmem:[%s1894_s6 + $0x8] sm:$0xff] %v853_v52  ;;  %v915_v36 = vmul.f32 %v964_v26, %v912_v15 }
 0x228   :  { %918 = vst [vmem:[%s1894_s6 + $0x10] sm:$0xff] %v914_v28 }
 0x229   :  { %919 = vst [vmem:[%s1894_s6 + $0x18] sm:$0xff] %v915_v36 }
 0x22a   :  { %924 = vsyncpa [#allocation4], 1 }

</bundles_post_ra>
